<compile_context>
chip_gen: v7x
topology: tpu7x:2x2x1
jax: 0.10.0
libtpu: 0.0.40
codegen_flags: <defaults>
</compile_context>

<pallas_src>
import functools

import jax
import jax.numpy as jnp
from jax.experimental import pallas as pl
from jax.experimental.pallas import tpu as pltpu

BETA_SHIFT = 0.5
MAX_ROW_TILE = 512      # rows (B*L) per grid step (upper bound)
LANE = 128              # TPU lane width


def _round_up(x, m):
    return ((x + m - 1) // m) * m


def _pick_row_tile(rows):
    """Biggest tile <= MAX_ROW_TILE that still leaves >= 2 grid steps."""
    if rows >= 2 * MAX_ROW_TILE:
        return MAX_ROW_TILE
    half = _round_up(max(rows // 2, 1), 8)
    return max(8, min(MAX_ROW_TILE, half))


def _vmem_limit_bytes(row_tile, dp, dvp, dap, single_buffer):
    wbuf = 1 if single_buffer else 2
    est = (2 * row_tile * (dp * 4 + dvp * 2 + dap * 2)         # dbl-buf inputs
           + 2 * row_tile * dp * 4                             # dbl-buf f32 out
           + wbuf * ((dp + dvp + dap) * 2 * dp * 2 + 8 * dp * 4)  # weights+bias
           + 6 * row_tile * dp * 4)                            # live f32 temps
    # 48 MiB fits inside v7x's 64 MiB physical VMEM with headroom for Mosaic
    # scratch; it is a no-op on v5e/v6e (128 MiB physical).
    limit = min(max(2 * est, 32 << 20), 48 << 20)
    return int(max(limit, est + (8 << 20)))


def mag_fusion_kernel(text_ref, video_ref, audio_ref,
                      wt_ref, wv_ref, wa_ref, bias_ref,
                      out_ref, *, d_real, dp):
    # Text arrives in f32 (exact residual / norms); video / audio in bf16.
    t32 = text_ref[...]                       # (RT, DP)   f32
    t_bf = t32.astype(jnp.bfloat16)

    bias = bias_ref[...]                      # (8, DP)    f32
    bgv, bga = bias[0:1, :], bias[1:2, :]
    bv, ba = bias[2:3, :], bias[3:4, :]
    gamma, beta = bias[4:5, :], bias[5:6, :]

    # Fused matmuls: each weight is [W_gate | W_proj] along the N dimension.
    tm = jnp.dot(t_bf, wt_ref[...], preferred_element_type=jnp.float32)  # (RT, 2*DP)

    # Video branch first: vm / gate_v fold into H and can die before am exists.
    vm = jnp.dot(video_ref[...], wv_ref[...], preferred_element_type=jnp.float32)
    gate_v = jnp.maximum(tm[:, :dp] + vm[:, :dp] + bgv, 0.0)
    h = gate_v * (vm[:, dp:] + bv)

    am = jnp.dot(audio_ref[...], wa_ref[...], preferred_element_type=jnp.float32)
    gate_a = jnp.maximum(tm[:, dp:] + am[:, :dp] + bga, 0.0)
    h = h + gate_a * (am[:, dp:] + ba)

    # alpha = min(beta_shift * ||t|| / ||H||, 1).  Padded lanes of t / h are
    # exactly zero (zero-padded inputs / weight columns), so full-width sums
    # are correct.
    eps = 1e-6
    ss_t = jnp.sum(t32 * t32, axis=-1, keepdims=True)
    ss_h = jnp.sum(h * h, axis=-1, keepdims=True)
    alpha = jnp.minimum(
        BETA_SHIFT * jnp.sqrt(ss_t + eps) * jax.lax.rsqrt(ss_h + eps), 1.0)

    fused = t32 + alpha * h

    # LayerNorm over the *real* feature dim d_real.  When D is not a multiple
    # of 128, padded lanes are zeroed via a precomputed mask row (row 6 of the
    # packed bias block); when D is lane-aligned the mask is skipped entirely.
    inv_d = 1.0 / float(d_real)
    mu = jnp.sum(fused, axis=-1, keepdims=True) * inv_d
    diff = fused - mu
    if d_real != dp:
        diff = diff * bias[6:7, :]            # 1.0 on real lanes, 0.0 on pad
    var = jnp.sum(diff * diff, axis=-1, keepdims=True) * inv_d
    out_ref[...] = (diff * jax.lax.rsqrt(var + 1e-5)) * gamma + beta


def mia_forward(text_feats, video_data, audio_data, params):
    """text_feats: (B, L, D); video_data: (B, L, Dv); audio_data: (B, L, Da)."""
    B, L, D = text_feats.shape
    Dv = video_data.shape[-1]
    Da = audio_data.shape[-1]
    R = B * L

    DP = _round_up(D, LANE)
    DVP = _round_up(Dv, LANE)
    DAP = _round_up(Da, LANE)
    row_tile = _pick_row_tile(R)
    grid = (pl.cdiv(R, row_tile),)

    def pad_cols(x, cols):
        c = x.shape[-1]
        return x if c == cols else jnp.pad(x, ((0, 0), (0, cols - c)))

    def pad2(x, rows, cols):
        r, c = x.shape
        if r == rows and c == cols:
            return x
        return jnp.pad(x, ((0, rows - r), (0, cols - c)))

    # Row-major [rows, feat] streams, lane-padded.  Text stays f32 (exact
    # residual / LN); video & audio are cast to bf16 *before* padding.
    t2 = pad_cols(text_feats.reshape(R, D).astype(jnp.float32), DP)
    v2 = pad_cols(video_data.reshape(R, Dv).astype(jnp.bfloat16), DVP)
    a2 = pad_cols(audio_data.reshape(R, Da).astype(jnp.bfloat16), DAP)

    bf = jnp.bfloat16
    # Fuse weight pairs along the output dimension (zero-padded to lane width).
    wt = jnp.concatenate([pad2(params["wgv_t"].astype(bf), DP, DP),
                          pad2(params["wga_t"].astype(bf), DP, DP)], axis=1)
    wv = jnp.concatenate([pad2(params["wgv_v"].astype(bf), DVP, DP),
                          pad2(params["wv"].astype(bf), DVP, DP)], axis=1)
    wa = jnp.concatenate([pad2(params["wga_a"].astype(bf), DAP, DP),
                          pad2(params["wa"].astype(bf), DAP, DP)], axis=1)

    # Pack all (1, D) vectors plus the LayerNorm lane mask into one
    # sublane-aligned (8, DP) f32 array -> a single grid-invariant DMA stream.
    bias_rows = jnp.concatenate(
        [params["bgv"], params["bga"], params["bv"], params["ba"],
         params["ln_gamma"], params["ln_beta"],
         jnp.ones((1, D), jnp.float32),          # row 6: lane mask
         jnp.zeros((1, D), jnp.float32)], axis=0)            # (8, D)
    bias_pack = pad_cols(bias_rows, DP)                      # (8, DP)

    kernel = functools.partial(mag_fusion_kernel, d_real=D, dp=DP)

    def make_in_specs(single_buffer):
        if single_buffer:
            def inv_spec(shape):
                return pl.BlockSpec(shape, lambda i: (0, 0),
                                    pipeline_mode=pl.Buffered(1))
        else:
            def inv_spec(shape):
                return pl.BlockSpec(shape, lambda i: (0, 0))
        return [
            pl.BlockSpec((row_tile, DP), lambda i: (i, 0)),
            pl.BlockSpec((row_tile, DVP), lambda i: (i, 0)),
            pl.BlockSpec((row_tile, DAP), lambda i: (i, 0)),
            inv_spec((DP, 2 * DP)),
            inv_spec((DVP, 2 * DP)),
            inv_spec((DAP, 2 * DP)),
            inv_spec((8, DP)),
        ]

    def run(single_buffer):
        return pl.pallas_call(
            kernel,
            out_shape=jax.ShapeDtypeStruct((R, DP), jnp.float32),
            grid_spec=pltpu.PrefetchScalarGridSpec(
                num_scalar_prefetch=0,
                grid=grid,
                in_specs=make_in_specs(single_buffer),
                out_specs=pl.BlockSpec((row_tile, DP), lambda i: (i, 0)),
            ),
            compiler_params=pltpu.CompilerParams(
                dimension_semantics=("parallel",),
                vmem_limit_bytes=_vmem_limit_bytes(row_tile, DP, DVP, DAP,
                                                   single_buffer)),
        )(t2, v2, a2, wt, wv, wa, bias_pack)

    try:
        # Preferred: single-buffer the grid-invariant weights / bias block.
        out = run(True)
    except Exception:
        # Fallback for JAX builds that reject pl.Buffered(1) on an input spec.
        out = run(False)

    if D != DP:
        out = out[:, :D]
    return out.reshape(B, L, D)


def init_params(key, D, Dv, Da):
    keys = jax.random.split(key, 8)
    s = 0.05
    return {
        "wgv_t": s * jax.random.normal(keys[0], (D, D), jnp.float32),
        "wgv_v": s * jax.random.normal(keys[1], (Dv, D), jnp.float32),
        "bgv": jnp.zeros((1, D), jnp.float32),
        "wga_t": s * jax.random.normal(keys[2], (D, D), jnp.float32),
        "wga_a": s * jax.random.normal(keys[3], (Da, D), jnp.float32),
        "bga": jnp.zeros((1, D), jnp.float32),
        "wv": s * jax.random.normal(keys[4], (Dv, D), jnp.float32),
        "bv": jnp.zeros((1, D), jnp.float32),
        "wa": s * jax.random.normal(keys[5], (Da, D), jnp.float32),
        "ba": jnp.zeros((1, D), jnp.float32),
        "ln_gamma": jnp.ones((1, D), jnp.float32),
        "ln_beta": jnp.zeros((1, D), jnp.float32),
    }


if __name__ == "__main__":
    B, L, D, Dv, Da = 2, 8, 32, 16, 16

    key = jax.random.PRNGKey(0)
    k_t, k_v, k_a, k_p = jax.random.split(key, 4)

    text_feats = jax.random.normal(k_t, (B, L, D), jnp.float32)
    video_data = jax.random.normal(k_v, (B, L, Dv), jnp.float32)
    audio_data = jax.random.normal(k_a, (B, L, Da), jnp.float32)

    params = init_params(k_p, D, Dv, Da)

    out = mia_forward(text_feats, video_data, audio_data, params)
    jax.block_until_ready(out)
    assert out.shape == (B, L, D)
    assert bool(jnp.all(jnp.isfinite(out)))
    print("KERNEL_OK")
</pallas_src>

<mosaic_0001>
module attributes {stable_mosaic.version = 11 : i64} {
  func.func @mag_fusion_kernel(%arg0: i32, %arg1: memref<8x128xf32, #tpu.memory_space<vmem>>, %arg2: memref<8x128xbf16, #tpu.memory_space<vmem>>, %arg3: memref<8x128xbf16, #tpu.memory_space<vmem>>, %arg4: memref<128x256xbf16, #tpu.memory_space<vmem>>, %arg5: memref<128x256xbf16, #tpu.memory_space<vmem>>, %arg6: memref<128x256xbf16, #tpu.memory_space<vmem>>, %arg7: memref<8x128xf32, #tpu.memory_space<vmem>>, %arg8: memref<8x128xf32, #tpu.memory_space<vmem>>) attributes {dimension_semantics = [#tpu.dimension_semantics<parallel>], iteration_bounds = array<i64: 2>, scalar_prefetch = 0 : i64, scratch_operands = 0 : i64, tpu.core_type = #tpu.core_type<tc>, window_params = [{transform_indices = @transform_0, window_bounds = array<i64: 8, 128>}, {transform_indices = @transform_1, window_bounds = array<i64: 8, 128>}, {transform_indices = @transform_2, window_bounds = array<i64: 8, 128>}, {pipeline_mode = #tpu.pipeline_mode<synchronous>, transform_indices = @transform_3, window_bounds = array<i64: 128, 256>}, {pipeline_mode = #tpu.pipeline_mode<synchronous>, transform_indices = @transform_4, window_bounds = array<i64: 128, 256>}, {pipeline_mode = #tpu.pipeline_mode<synchronous>, transform_indices = @transform_5, window_bounds = array<i64: 128, 256>}, {pipeline_mode = #tpu.pipeline_mode<synchronous>, transform_indices = @transform_6, window_bounds = array<i64: 8, 128>}, {transform_indices = @transform_7, window_bounds = array<i64: 8, 128>}]} {
    %c0 = arith.constant 0 : index
    %c0_0 = arith.constant 0 : index
    %0 = vector.load %arg1[%c0, %c0_0] : memref<8x128xf32, #tpu.memory_space<vmem>>, vector<8x128xf32>
    %1 = arith.truncf %0 : vector<8x128xf32> to vector<8x128xbf16>
    %c0_1 = arith.constant 0 : index
    %c0_2 = arith.constant 0 : index
    %2 = vector.load %arg7[%c0_1, %c0_2] : memref<8x128xf32, #tpu.memory_space<vmem>>, vector<8x128xf32>
    %3 = vector.extract_strided_slice %2 {offsets = [0, 0], sizes = [1, 128], strides = [1, 1]} : vector<8x128xf32> to vector<1x128xf32>
    %4 = vector.extract_strided_slice %2 {offsets = [1, 0], sizes = [1, 128], strides = [1, 1]} : vector<8x128xf32> to vector<1x128xf32>
    %5 = vector.extract_strided_slice %2 {offsets = [2, 0], sizes = [1, 128], strides = [1, 1]} : vector<8x128xf32> to vector<1x128xf32>
    %6 = vector.extract_strided_slice %2 {offsets = [3, 0], sizes = [1, 128], strides = [1, 1]} : vector<8x128xf32> to vector<1x128xf32>
    %7 = vector.extract_strided_slice %2 {offsets = [4, 0], sizes = [1, 128], strides = [1, 1]} : vector<8x128xf32> to vector<1x128xf32>
    %8 = vector.extract_strided_slice %2 {offsets = [5, 0], sizes = [1, 128], strides = [1, 1]} : vector<8x128xf32> to vector<1x128xf32>
    %c0_3 = arith.constant 0 : index
    %c0_4 = arith.constant 0 : index
    %9 = vector.load %arg4[%c0_3, %c0_4] : memref<128x256xbf16, #tpu.memory_space<vmem>>, vector<128x256xbf16>
    %cst = arith.constant dense<0.000000e+00> : vector<8x256xf32>
    %10 = tpu.matmul %1, %9, %cst {dimension_numbers = #tpu.dot_dimension_numbers<[1], [0], [0], [1], [0, 0, 1, 1], [], []>} : vector<8x128xbf16>, vector<128x256xbf16>, vector<8x256xf32> -> vector<8x256xf32>
    %c0_5 = arith.constant 0 : index
    %c0_6 = arith.constant 0 : index
    %11 = vector.load %arg2[%c0_5, %c0_6] : memref<8x128xbf16, #tpu.memory_space<vmem>>, vector<8x128xbf16>
    %c0_7 = arith.constant 0 : index
    %c0_8 = arith.constant 0 : index
    %12 = vector.load %arg5[%c0_7, %c0_8] : memref<128x256xbf16, #tpu.memory_space<vmem>>, vector<128x256xbf16>
    %cst_9 = arith.constant dense<0.000000e+00> : vector<8x256xf32>
    %13 = tpu.matmul %11, %12, %cst_9 {dimension_numbers = #tpu.dot_dimension_numbers<[1], [0], [0], [1], [0, 0, 1, 1], [], []>} : vector<8x128xbf16>, vector<128x256xbf16>, vector<8x256xf32> -> vector<8x256xf32>
    %14 = vector.extract_strided_slice %10 {offsets = [0, 0], sizes = [8, 128], strides = [1, 1]} : vector<8x256xf32> to vector<8x128xf32>
    %15 = vector.extract_strided_slice %13 {offsets = [0, 0], sizes = [8, 128], strides = [1, 1]} : vector<8x256xf32> to vector<8x128xf32>
    %16 = arith.addf %14, %15 : vector<8x128xf32>
    %17 = vector.broadcast %3 : vector<1x128xf32> to vector<8x128xf32>
    %18 = arith.addf %16, %17 : vector<8x128xf32>
    %cst_10 = arith.constant 0.000000e+00 : f32
    %19 = vector.broadcast %cst_10 : f32 to vector<8x128xf32>
    %20 = arith.maximumf %18, %19 : vector<8x128xf32>
    %21 = vector.extract_strided_slice %13 {offsets = [0, 128], sizes = [8, 128], strides = [1, 1]} : vector<8x256xf32> to vector<8x128xf32>
    %22 = vector.broadcast %5 : vector<1x128xf32> to vector<8x128xf32>
    %23 = arith.addf %21, %22 : vector<8x128xf32>
    %24 = arith.mulf %20, %23 : vector<8x128xf32>
    %c0_11 = arith.constant 0 : index
    %c0_12 = arith.constant 0 : index
    %25 = vector.load %arg3[%c0_11, %c0_12] : memref<8x128xbf16, #tpu.memory_space<vmem>>, vector<8x128xbf16>
    %c0_13 = arith.constant 0 : index
    %c0_14 = arith.constant 0 : index
    %26 = vector.load %arg6[%c0_13, %c0_14] : memref<128x256xbf16, #tpu.memory_space<vmem>>, vector<128x256xbf16>
    %cst_15 = arith.constant dense<0.000000e+00> : vector<8x256xf32>
    %27 = tpu.matmul %25, %26, %cst_15 {dimension_numbers = #tpu.dot_dimension_numbers<[1], [0], [0], [1], [0, 0, 1, 1], [], []>} : vector<8x128xbf16>, vector<128x256xbf16>, vector<8x256xf32> -> vector<8x256xf32>
    %28 = vector.extract_strided_slice %10 {offsets = [0, 128], sizes = [8, 128], strides = [1, 1]} : vector<8x256xf32> to vector<8x128xf32>
    %29 = vector.extract_strided_slice %27 {offsets = [0, 0], sizes = [8, 128], strides = [1, 1]} : vector<8x256xf32> to vector<8x128xf32>
    %30 = arith.addf %28, %29 : vector<8x128xf32>
    %31 = vector.broadcast %4 : vector<1x128xf32> to vector<8x128xf32>
    %32 = arith.addf %30, %31 : vector<8x128xf32>
    %cst_16 = arith.constant 0.000000e+00 : f32
    %33 = vector.broadcast %cst_16 : f32 to vector<8x128xf32>
    %34 = arith.maximumf %32, %33 : vector<8x128xf32>
    %35 = vector.extract_strided_slice %27 {offsets = [0, 128], sizes = [8, 128], strides = [1, 1]} : vector<8x256xf32> to vector<8x128xf32>
    %36 = vector.broadcast %6 : vector<1x128xf32> to vector<8x128xf32>
    %37 = arith.addf %35, %36 : vector<8x128xf32>
    %38 = arith.mulf %34, %37 : vector<8x128xf32>
    %39 = arith.addf %24, %38 : vector<8x128xf32>
    %40 = arith.mulf %0, %0 : vector<8x128xf32>
    %cst_17 = arith.constant dense<0.000000e+00> : vector<8xf32>
    %41 = vector.multi_reduction <add>, %40, %cst_17 [1] : vector<8x128xf32> to vector<8xf32>
    %42 = vector.shape_cast %41 : vector<8xf32> to vector<8x1xf32>
    %43 = arith.mulf %39, %39 : vector<8x128xf32>
    %cst_18 = arith.constant dense<0.000000e+00> : vector<8xf32>
    %44 = vector.multi_reduction <add>, %43, %cst_18 [1] : vector<8x128xf32> to vector<8xf32>
    %45 = vector.shape_cast %44 : vector<8xf32> to vector<8x1xf32>
    %cst_19 = arith.constant 9.99999997E-7 : f32
    %46 = vector.broadcast %cst_19 : f32 to vector<8x1xf32>
    %47 = arith.addf %42, %46 : vector<8x1xf32>
    %48 = math.sqrt %47 : vector<8x1xf32>
    %cst_20 = arith.constant 5.000000e-01 : f32
    %49 = vector.broadcast %cst_20 : f32 to vector<8x1xf32>
    %50 = arith.mulf %49, %48 : vector<8x1xf32>
    %cst_21 = arith.constant 9.99999997E-7 : f32
    %51 = vector.broadcast %cst_21 : f32 to vector<8x1xf32>
    %52 = arith.addf %45, %51 : vector<8x1xf32>
    %53 = math.rsqrt %52 : vector<8x1xf32>
    %54 = arith.mulf %50, %53 : vector<8x1xf32>
    %cst_22 = arith.constant 1.000000e+00 : f32
    %55 = vector.broadcast %cst_22 : f32 to vector<8x1xf32>
    %56 = arith.minimumf %54, %55 : vector<8x1xf32>
    %57 = vector.broadcast %56 : vector<8x1xf32> to vector<8x128xf32>
    %58 = arith.mulf %57, %39 : vector<8x128xf32>
    %59 = arith.addf %0, %58 : vector<8x128xf32>
    %cst_23 = arith.constant dense<0.000000e+00> : vector<8xf32>
    %60 = vector.multi_reduction <add>, %59, %cst_23 [1] : vector<8x128xf32> to vector<8xf32>
    %61 = vector.shape_cast %60 : vector<8xf32> to vector<8x1xf32>
    %cst_24 = arith.constant 3.125000e-02 : f32
    %62 = vector.broadcast %cst_24 : f32 to vector<8x1xf32>
    %63 = arith.mulf %61, %62 : vector<8x1xf32>
    %64 = vector.broadcast %63 : vector<8x1xf32> to vector<8x128xf32>
    %65 = arith.subf %59, %64 : vector<8x128xf32>
    %66 = vector.extract_strided_slice %2 {offsets = [6, 0], sizes = [1, 128], strides = [1, 1]} : vector<8x128xf32> to vector<1x128xf32>
    %67 = vector.broadcast %66 : vector<1x128xf32> to vector<8x128xf32>
    %68 = arith.mulf %65, %67 : vector<8x128xf32>
    %69 = arith.mulf %68, %68 : vector<8x128xf32>
    %cst_25 = arith.constant dense<0.000000e+00> : vector<8xf32>
    %70 = vector.multi_reduction <add>, %69, %cst_25 [1] : vector<8x128xf32> to vector<8xf32>
    %71 = vector.shape_cast %70 : vector<8xf32> to vector<8x1xf32>
    %cst_26 = arith.constant 3.125000e-02 : f32
    %72 = vector.broadcast %cst_26 : f32 to vector<8x1xf32>
    %73 = arith.mulf %71, %72 : vector<8x1xf32>
    %cst_27 = arith.constant 9.99999974E-6 : f32
    %74 = vector.broadcast %cst_27 : f32 to vector<8x1xf32>
    %75 = arith.addf %73, %74 : vector<8x1xf32>
    %76 = math.rsqrt %75 : vector<8x1xf32>
    %77 = vector.broadcast %76 : vector<8x1xf32> to vector<8x128xf32>
    %78 = arith.mulf %68, %77 : vector<8x128xf32>
    %79 = vector.broadcast %7 : vector<1x128xf32> to vector<8x128xf32>
    %80 = arith.mulf %78, %79 : vector<8x128xf32>
    %81 = vector.broadcast %8 : vector<1x128xf32> to vector<8x128xf32>
    %82 = arith.addf %80, %81 : vector<8x128xf32>
    %c0_28 = arith.constant 0 : index
    %c0_29 = arith.constant 0 : index
    %83 = vector.load %arg8[%c0_28, %c0_29] : memref<8x128xf32, #tpu.memory_space<vmem>>, vector<8x128xf32>
    tpu.vector_store %arg8[%c0_28, %c0_29], %82 {strides = array<i32>} : memref<8x128xf32, #tpu.memory_space<vmem>>, vector<8x128xf32>,
    return
  }
  func.func @transform_0(%arg0: i32) -> (i32, i32) {
    %c0_i32 = arith.constant 0 : i32
    %c0_i32_0 = arith.constant 0 : i32
    return %arg0, %c0_i32 : i32, i32
  }
  func.func @transform_1(%arg0: i32) -> (i32, i32) {
    %c0_i32 = arith.constant 0 : i32
    %c0_i32_0 = arith.constant 0 : i32
    return %arg0, %c0_i32 : i32, i32
  }
  func.func @transform_2(%arg0: i32) -> (i32, i32) {
    %c0_i32 = arith.constant 0 : i32
    %c0_i32_0 = arith.constant 0 : i32
    return %arg0, %c0_i32 : i32, i32
  }
  func.func @transform_3(%arg0: i32) -> (i32, i32) {
    %c0_i32 = arith.constant 0 : i32
    %c0_i32_0 = arith.constant 0 : i32
    %c0_i32_1 = arith.constant 0 : i32
    return %c0_i32, %c0_i32_0 : i32, i32
  }
  func.func @transform_4(%arg0: i32) -> (i32, i32) {
    %c0_i32 = arith.constant 0 : i32
    %c0_i32_0 = arith.constant 0 : i32
    %c0_i32_1 = arith.constant 0 : i32
    return %c0_i32, %c0_i32_0 : i32, i32
  }
  func.func @transform_5(%arg0: i32) -> (i32, i32) {
    %c0_i32 = arith.constant 0 : i32
    %c0_i32_0 = arith.constant 0 : i32
    %c0_i32_1 = arith.constant 0 : i32
    return %c0_i32, %c0_i32_0 : i32, i32
  }
  func.func @transform_6(%arg0: i32) -> (i32, i32) {
    %c0_i32 = arith.constant 0 : i32
    %c0_i32_0 = arith.constant 0 : i32
    %c0_i32_1 = arith.constant 0 : i32
    return %c0_i32, %c0_i32_0 : i32, i32
  }
  func.func @transform_7(%arg0: i32) -> (i32, i32) {
    %c0_i32 = arith.constant 0 : i32
    %c0_i32_0 = arith.constant 0 : i32
    return %arg0, %c0_i32 : i32, i32
  }
}

module attributes {stable_mosaic.version = 11 : i64} {
  func.func @mag_fusion_kernel(%arg0: i32, %arg1: memref<8x128xf32, #tpu.memory_space<vmem>>, %arg2: memref<8x128xbf16, #tpu.memory_space<vmem>>, %arg3: memref<8x128xbf16, #tpu.memory_space<vmem>>, %arg4: memref<128x256xbf16, #tpu.memory_space<vmem>>, %arg5: memref<128x256xbf16, #tpu.memory_space<vmem>>, %arg6: memref<128x256xbf16, #tpu.memory_space<vmem>>, %arg7: memref<8x128xf32, #tpu.memory_space<vmem>>, %arg8: memref<8x128xf32, #tpu.memory_space<vmem>>) attributes {dimension_semantics = [#tpu.dimension_semantics<parallel>], iteration_bounds = array<i64: 2>, scalar_prefetch = 0 : i64, scratch_operands = 0 : i64, tpu.core_type = #tpu.core_type<tc>, window_params = [{transform_indices = @transform_0, window_bounds = array<i64: 8, 128>}, {transform_indices = @transform_1, window_bounds = array<i64: 8, 128>}, {transform_indices = @transform_2, window_bounds = array<i64: 8, 128>}, {pipeline_mode = #tpu.pipeline_mode<synchronous>, transform_indices = @transform_3, window_bounds = array<i64: 128, 256>}, {pipeline_mode = #tpu.pipeline_mode<synchronous>, transform_indices = @transform_4, window_bounds = array<i64: 128, 256>}, {pipeline_mode = #tpu.pipeline_mode<synchronous>, transform_indices = @transform_5, window_bounds = array<i64: 128, 256>}, {pipeline_mode = #tpu.pipeline_mode<synchronous>, transform_indices = @transform_6, window_bounds = array<i64: 8, 128>}, {transform_indices = @transform_7, window_bounds = array<i64: 8, 128>}]} {
    %c0 = arith.constant 0 : index
    %c0_0 = arith.constant 0 : index
    %0 = vector.load %arg1[%c0, %c0_0] : memref<8x128xf32, #tpu.memory_space<vmem>>, vector<8x128xf32>
    %1 = arith.truncf %0 : vector<8x128xf32> to vector<8x128xbf16>
    %c0_1 = arith.constant 0 : index
    %c0_2 = arith.constant 0 : index
    %2 = vector.load %arg7[%c0_1, %c0_2] : memref<8x128xf32, #tpu.memory_space<vmem>>, vector<8x128xf32>
    %3 = vector.extract_strided_slice %2 {offsets = [0, 0], sizes = [1, 128], strides = [1, 1]} : vector<8x128xf32> to vector<1x128xf32>
    %4 = vector.extract_strided_slice %2 {offsets = [1, 0], sizes = [1, 128], strides = [1, 1]} : vector<8x128xf32> to vector<1x128xf32>
    %5 = vector.extract_strided_slice %2 {offsets = [2, 0], sizes = [1, 128], strides = [1, 1]} : vector<8x128xf32> to vector<1x128xf32>
    %6 = vector.extract_strided_slice %2 {offsets = [3, 0], sizes = [1, 128], strides = [1, 1]} : vector<8x128xf32> to vector<1x128xf32>
    %7 = vector.extract_strided_slice %2 {offsets = [4, 0], sizes = [1, 128], strides = [1, 1]} : vector<8x128xf32> to vector<1x128xf32>
    %8 = vector.extract_strided_slice %2 {offsets = [5, 0], sizes = [1, 128], strides = [1, 1]} : vector<8x128xf32> to vector<1x128xf32>
    %c0_3 = arith.constant 0 : index
    %c0_4 = arith.constant 0 : index
    %9 = vector.load %arg4[%c0_3, %c0_4] : memref<128x256xbf16, #tpu.memory_space<vmem>>, vector<128x256xbf16>
    %cst = arith.constant dense<0.000000e+00> : vector<8x256xf32>
    %10 = tpu.matmul %1, %9, %cst {dimension_numbers = #tpu.dot_dimension_numbers<[1], [0], [0], [1], [0, 0, 1, 1], [], []>} : vector<8x128xbf16>, vector<128x256xbf16>, vector<8x256xf32> -> vector<8x256xf32>
    %c0_5 = arith.constant 0 : index
    %c0_6 = arith.constant 0 : index
    %11 = vector.load %arg2[%c0_5, %c0_6] : memref<8x128xbf16, #tpu.memory_space<vmem>>, vector<8x128xbf16>
    %c0_7 = arith.constant 0 : index
    %c0_8 = arith.constant 0 : index
    %12 = vector.load %arg5[%c0_7, %c0_8] : memref<128x256xbf16, #tpu.memory_space<vmem>>, vector<128x256xbf16>
    %cst_9 = arith.constant dense<0.000000e+00> : vector<8x256xf32>
    %13 = tpu.matmul %11, %12, %cst_9 {dimension_numbers = #tpu.dot_dimension_numbers<[1], [0], [0], [1], [0, 0, 1, 1], [], []>} : vector<8x128xbf16>, vector<128x256xbf16>, vector<8x256xf32> -> vector<8x256xf32>
    %14 = vector.extract_strided_slice %10 {offsets = [0, 0], sizes = [8, 128], strides = [1, 1]} : vector<8x256xf32> to vector<8x128xf32>
    %15 = vector.extract_strided_slice %13 {offsets = [0, 0], sizes = [8, 128], strides = [1, 1]} : vector<8x256xf32> to vector<8x128xf32>
    %16 = arith.addf %14, %15 : vector<8x128xf32>
    %17 = vector.broadcast %3 : vector<1x128xf32> to vector<8x128xf32>
    %18 = arith.addf %16, %17 : vector<8x128xf32>
    %cst_10 = arith.constant 0.000000e+00 : f32
    %19 = vector.broadcast %cst_10 : f32 to vector<8x128xf32>
    %20 = arith.maximumf %18, %19 : vector<8x128xf32>
    %21 = vector.extract_strided_slice %13 {offsets = [0, 128], sizes = [8, 128], strides = [1, 1]} : vector<8x256xf32> to vector<8x128xf32>
    %22 = vector.broadcast %5 : vector<1x128xf32> to vector<8x128xf32>
    %23 = arith.addf %21, %22 : vector<8x128xf32>
    %24 = arith.mulf %20, %23 : vector<8x128xf32>
    %c0_11 = arith.constant 0 : index
    %c0_12 = arith.constant 0 : index
    %25 = vector.load %arg3[%c0_11, %c0_12] : memref<8x128xbf16, #tpu.memory_space<vmem>>, vector<8x128xbf16>
    %c0_13 = arith.constant 0 : index
    %c0_14 = arith.constant 0 : index
    %26 = vector.load %arg6[%c0_13, %c0_14] : memref<128x256xbf16, #tpu.memory_space<vmem>>, vector<128x256xbf16>
    %cst_15 = arith.constant dense<0.000000e+00> : vector<8x256xf32>
    %27 = tpu.matmul %25, %26, %cst_15 {dimension_numbers = #tpu.dot_dimension_numbers<[1], [0], [0], [1], [0, 0, 1, 1], [], []>} : vector<8x128xbf16>, vector<128x256xbf16>, vector<8x256xf32> -> vector<8x256xf32>
    %28 = vector.extract_strided_slice %10 {offsets = [0, 128], sizes = [8, 128], strides = [1, 1]} : vector<8x256xf32> to vector<8x128xf32>
    %29 = vector.extract_strided_slice %27 {offsets = [0, 0], sizes = [8, 128], strides = [1, 1]} : vector<8x256xf32> to vector<8x128xf32>
    %30 = arith.addf %28, %29 : vector<8x128xf32>
    %31 = vector.broadcast %4 : vector<1x128xf32> to vector<8x128xf32>
    %32 = arith.addf %30, %31 : vector<8x128xf32>
    %cst_16 = arith.constant 0.000000e+00 : f32
    %33 = vector.broadcast %cst_16 : f32 to vector<8x128xf32>
    %34 = arith.maximumf %32, %33 : vector<8x128xf32>
    %35 = vector.extract_strided_slice %27 {offsets = [0, 128], sizes = [8, 128], strides = [1, 1]} : vector<8x256xf32> to vector<8x128xf32>
    %36 = vector.broadcast %6 : vector<1x128xf32> to vector<8x128xf32>
    %37 = arith.addf %35, %36 : vector<8x128xf32>
    %38 = arith.mulf %34, %37 : vector<8x128xf32>
    %39 = arith.addf %24, %38 : vector<8x128xf32>
    %40 = arith.mulf %0, %0 : vector<8x128xf32>
    %cst_17 = arith.constant dense<0.000000e+00> : vector<8xf32>
    %41 = vector.multi_reduction <add>, %40, %cst_17 [1] : vector<8x128xf32> to vector<8xf32>
    %42 = vector.shape_cast %41 : vector<8xf32> to vector<8x1xf32>
    %43 = arith.mulf %39, %39 : vector<8x128xf32>
    %cst_18 = arith.constant dense<0.000000e+00> : vector<8xf32>
    %44 = vector.multi_reduction <add>, %43, %cst_18 [1] : vector<8x128xf32> to vector<8xf32>
    %45 = vector.shape_cast %44 : vector<8xf32> to vector<8x1xf32>
    %cst_19 = arith.constant 9.99999997E-7 : f32
    %46 = vector.broadcast %cst_19 : f32 to vector<8x1xf32>
    %47 = arith.addf %42, %46 : vector<8x1xf32>
    %48 = math.sqrt %47 : vector<8x1xf32>
    %cst_20 = arith.constant 5.000000e-01 : f32
    %49 = vector.broadcast %cst_20 : f32 to vector<8x1xf32>
    %50 = arith.mulf %49, %48 : vector<8x1xf32>
    %cst_21 = arith.constant 9.99999997E-7 : f32
    %51 = vector.broadcast %cst_21 : f32 to vector<8x1xf32>
    %52 = arith.addf %45, %51 : vector<8x1xf32>
    %53 = math.rsqrt %52 : vector<8x1xf32>
    %54 = arith.mulf %50, %53 : vector<8x1xf32>
    %cst_22 = arith.constant 1.000000e+00 : f32
    %55 = vector.broadcast %cst_22 : f32 to vector<8x1xf32>
    %56 = arith.minimumf %54, %55 : vector<8x1xf32>
    %57 = vector.broadcast %56 : vector<8x1xf32> to vector<8x128xf32>
    %58 = arith.mulf %57, %39 : vector<8x128xf32>
    %59 = arith.addf %0, %58 : vector<8x128xf32>
    %cst_23 = arith.constant dense<0.000000e+00> : vector<8xf32>
    %60 = vector.multi_reduction <add>, %59, %cst_23 [1] : vector<8x128xf32> to vector<8xf32>
    %61 = vector.shape_cast %60 : vector<8xf32> to vector<8x1xf32>
    %cst_24 = arith.constant 3.125000e-02 : f32
    %62 = vector.broadcast %cst_24 : f32 to vector<8x1xf32>
    %63 = arith.mulf %61, %62 : vector<8x1xf32>
    %64 = vector.broadcast %63 : vector<8x1xf32> to vector<8x128xf32>
    %65 = arith.subf %59, %64 : vector<8x128xf32>
    %66 = vector.extract_strided_slice %2 {offsets = [6, 0], sizes = [1, 128], strides = [1, 1]} : vector<8x128xf32> to vector<1x128xf32>
    %67 = vector.broadcast %66 : vector<1x128xf32> to vector<8x128xf32>
    %68 = arith.mulf %65, %67 : vector<8x128xf32>
    %69 = arith.mulf %68, %68 : vector<8x128xf32>
    %cst_25 = arith.constant dense<0.000000e+00> : vector<8xf32>
    %70 = vector.multi_reduction <add>, %69, %cst_25 [1] : vector<8x128xf32> to vector<8xf32>
    %71 = vector.shape_cast %70 : vector<8xf32> to vector<8x1xf32>
    %cst_26 = arith.constant 3.125000e-02 : f32
    %72 = vector.broadcast %cst_26 : f32 to vector<8x1xf32>
    %73 = arith.mulf %71, %72 : vector<8x1xf32>
    %cst_27 = arith.constant 9.99999974E-6 : f32
    %74 = vector.broadcast %cst_27 : f32 to vector<8x1xf32>
    %75 = arith.addf %73, %74 : vector<8x1xf32>
    %76 = math.rsqrt %75 : vector<8x1xf32>
    %77 = vector.broadcast %76 : vector<8x1xf32> to vector<8x128xf32>
    %78 = arith.mulf %68, %77 : vector<8x128xf32>
    %79 = vector.broadcast %7 : vector<1x128xf32> to vector<8x128xf32>
    %80 = arith.mulf %78, %79 : vector<8x128xf32>
    %81 = vector.broadcast %8 : vector<1x128xf32> to vector<8x128xf32>
    %82 = arith.addf %80, %81 : vector<8x128xf32>
    %c0_28 = arith.constant 0 : index
    %c0_29 = arith.constant 0 : index
    %83 = vector.load %arg8[%c0_28, %c0_29] : memref<8x128xf32, #tpu.memory_space<vmem>>, vector<8x128xf32>
    tpu.vector_store %arg8[%c0_28, %c0_29], %82 {strides = array<i32>} : memref<8x128xf32, #tpu.memory_space<vmem>>, vector<8x128xf32>,
    return
  }
  func.func @transform_0(%arg0: i32) -> (i32, i32) {
    %c0_i32 = arith.constant 0 : i32
    %c0_i32_0 = arith.constant 0 : i32
    return %arg0, %c0_i32 : i32, i32
  }
  func.func @transform_1(%arg0: i32) -> (i32, i32) {
    %c0_i32 = arith.constant 0 : i32
    %c0_i32_0 = arith.constant 0 : i32
    return %arg0, %c0_i32 : i32, i32
  }
  func.func @transform_2(%arg0: i32) -> (i32, i32) {
    %c0_i32 = arith.constant 0 : i32
    %c0_i32_0 = arith.constant 0 : i32
    return %arg0, %c0_i32 : i32, i32
  }
  func.func @transform_3(%arg0: i32) -> (i32, i32) {
    %c0_i32 = arith.constant 0 : i32
    %c0_i32_0 = arith.constant 0 : i32
    %c0_i32_1 = arith.constant 0 : i32
    return %c0_i32, %c0_i32_0 : i32, i32
  }
  func.func @transform_4(%arg0: i32) -> (i32, i32) {
    %c0_i32 = arith.constant 0 : i32
    %c0_i32_0 = arith.constant 0 : i32
    %c0_i32_1 = arith.constant 0 : i32
    return %c0_i32, %c0_i32_0 : i32, i32
  }
  func.func @transform_5(%arg0: i32) -> (i32, i32) {
    %c0_i32 = arith.constant 0 : i32
    %c0_i32_0 = arith.constant 0 : i32
    %c0_i32_1 = arith.constant 0 : i32
    return %c0_i32, %c0_i32_0 : i32, i32
  }
  func.func @transform_6(%arg0: i32) -> (i32, i32) {
    %c0_i32 = arith.constant 0 : i32
    %c0_i32_0 = arith.constant 0 : i32
    %c0_i32_1 = arith.constant 0 : i32
    return %c0_i32, %c0_i32_0 : i32, i32
  }
  func.func @transform_7(%arg0: i32) -> (i32, i32) {
    %c0_i32 = arith.constant 0 : i32
    %c0_i32_0 = arith.constant 0 : i32
    return %arg0, %c0_i32 : i32, i32
  }
}

</mosaic_0001>

<bundles_post_ra>
// kernel: tpu_custom_call.1
= control target key start
LH: loop header
LB: loop body
LE: loop exit
PB: predicated region body
PF: predicated region fallthrough
CT: control target
= control target key end

     0   :  { %s1981_s0 = inlined_call_operand.hbm [shape: f32[16,128], index: 0, kind: input, shape index: {}]   ;;  %s1982_s1 = inlined_call_operand.hbm [shape: bf16[16,128], index: 1, kind: input, shape index: {}]   ;;  %s1983_s2 = inlined_call_operand.hbm [shape: bf16[16,128], index: 2, kind: input, shape index: {}]   ;;  %s1984_s3 = inlined_call_operand.hbm [shape: bf16[128,256], index: 3, kind: input, shape index: {}]   ;;  %s1985_s4 = inlined_call_operand.hbm [shape: bf16[128,256], index: 4, kind: input, shape index: {}]   ;;  %s1986_s5 = inlined_call_operand.hbm [shape: bf16[128,256], index: 5, kind: input, shape index: {}]   ;;  %s1987_s6 = inlined_call_operand.vmem [shape: f32[8,128], index: 6, kind: input, shape index: {}]   ;;  %s1988_s7 = inlined_call_operand.hbm [shape: f32[16,128], index: 7, kind: output, shape index: {}]  }
   0x1   :  { %2015 = sst [smem:[#allocation25_spill]] %s1982_s1 }
   0x2   :  { %2016 = sst [smem:[#allocation26_spill]] %s1984_s3 }
   0x3   :  { %2017 = sst [smem:[#allocation27_spill]] %s1988_s7 }
   0x4   :  { %12 = vsyncpa [#allocation3], 0 }
   0x5   :  { %14 = vsyncpa [#allocation3 + $0x1], 0 }
   0x6   :  { %15 = vsyncpa [#allocation6], 0 }
   0x7   :  { %17 = vsyncpa [#allocation6 + $0x1], 0 }
   0x8   :  { %18 = vsyncpa [#allocation9], 0 }
   0x9   :  { %19 = vsyncpa [#allocation12], 0 }
   0xa   :  { %20 = vsyncpa [#allocation4], 0 }
   0xb   :  { %22 = vsyncpa [#allocation4 + $0x1], 0  ;;  %s1601_s24 = smov 0   ;;  %s1603_s25 = smov 0  }
   0xc   :  { %s1605_s26 = smov 0   ;;  %s1607_s27 = smov 0  }
   0xd LB: > { %2018 = sst [smem:[#allocation19_spill]] %s1537_s24  ;;  %s1622_s28 = sadd.s32 4294967295, %s1549_s27   ;;  %s1549_s27 = sphi %s1607_s27, %s2056_s27   ;;  %s1545_s26 = sphi %s1605_s26, %s2058_s26   ;;  %s1541_s25 = sphi %s1603_s25, %s2060_s25   ;;  %s1537_s24 = sphi %s1601_s24, %s2059_s24  }
   0xe   : > { %2019 = sst [smem:[#allocation20_spill]] %s1545_s26  ;;  %s1057_s29 = sadd.s32 4294967294, %s1549_s27  }
   0xf   : > { %p48_p0 = scmp.ne.s32.totalorder %s1541_s25, %s1537_s24  ;;  %p1989_p1 = scmp.eq.s32.totalorder %s1622_s28, 0 }
  0x10   : > { %p214_p3 = scmp.eq.s32.totalorder %s1057_s29, 1  ;;  %p1058_p5 = scmp.ge.s32.totalorder %s1549_s27, 1 }
  0x11   : > { %p1631_p4 = por %p1989_p1, %p48_p0  ;;  %p221_p7 = scmp.lt.s32.totalorder %s1549_s27, 3 }
  0x12   : > { %p1636_p6 = por %p214_p3, %p48_p0  ;;  %s1551_s10 = smov [#allocation8]  }
  0x13   : > { %s2020_s30 = scalar_select %p1631_p4, 1, 0 }
  0x14   : > { %s2021_s8 = scalar_select %p1636_p6, 1, 0 }
  0x15   : > { %p1641_p8 = pnand %p1058_p5, %p221_p7  ;;  %s233_s11 = sshll.u32 %s1551_s10, 4  ;;  %s1645_s11 = int_to_ptr.vmem [resolvable:$true] %s233_s11 }
  0x16   : > { %2022 = sst [smem:[#allocation21_spill]] %s2021_s8  ;;  %s1657_s13 = sadd.s32 1, %s1549_s27  }
  0x17   : > { %s2023_s9 = scalar_select %p1641_p8, 1, 0 }
  0x18   : > { %p1149_p9 = pneg %p1641_p8  ;;  %2025 = sst [smem:[#allocation22_spill]] %s1657_s13 }
  0x19   : > { %s35_s14 = sadd.s32 1, %s1545_s26  ;;  %s32_s15 = ssub.s32 %s1549_s27, %s1657_s13 }
  0x1a   : > { %p1652_p11 = pnand %p1149_p9, %p1989_p1  ;;  %s2026_s3 = sld [smem:[#allocation26_spill]] }
  0x1c   : > { %s2024_s12 = scalar_select %p1652_p11, 1, 0 }
  0x1d   : > { %p1670_p13 = pneg %p1652_p11 }
  0x1f   : > { %s2027_s21 = scalar_select %p1670_p13, 1, 0 }
  0x20   : > { %s1297_s18 = scalar_lea.hbm %s2026_s3, 2048 }
  0x21   : > { %p1298_p12 = scmp.ne.s32.totalorder %s2026_s3, %s1297_s18  ;;  %p1304_p5 = scmp.lt.u32.totalorder %s1297_s18, %s2026_s3 }
  0x23   : > { %p1300_p0 = pnand %p1670_p13, %p1298_p12 }
  0x25   : > { %p1301_p3 = pneg %p1300_p0 }
  0x27   : > { %p1306_p7 = pnand %p1304_p5, %p1301_p3 }
  0x29   : > { %1309 = shalt.err (!%p1306_p7)
}
  0x2a   : > { %s1310_s29 = scalar_lea.vmem %s1645_s11, 2048  ;;  %p1318_p2 = scmp.lt.s32.totalorder %s1645_s11, %s1645_s11 }
  0x2b   : > { %p1311_p9 = scmp.ne.s32.totalorder %s1645_s11, %s1310_s29  ;;  %p1319_p6 = scmp.lt.s32.totalorder %s1310_s29, %s1310_s29 }
  0x2d   : > { %p1313_p10 = pnand %p1311_p9, %p1670_p13  ;;  %p1320_p12 = por %p1319_p6, %p1318_p2 }
  0x2f   : > { %p1314_p1 = pneg %p1313_p10 }
  0x31   : > { %p1321_p0 = pnand %p1320_p12, %p1314_p1 }
  0x33   : > { %1324 = shalt.err (!%p1321_p0)
}
  0x34   : > { %s1990_s10 = smov 128   ;;  %s1992_s16 = smov 8  }
  0x35   : > { %1152 = dma.hbm_to_vmem [thread:$0]  (!%p1652_p11), %s2026_s3, 2048, %s1645_s11, [#allocation9], %s1990_s10, %s1990_s10, %s1992_s16  }
  0x36   : > { %p33_p1 = scmp.eq.s32.totalorder %s32_s15, 0  ;;  %p42_p2 = scmp.ne.s32.totalorder %s1545_s26, %s1541_s25 }
  0x37   : > { %p43_p6 = scmp.eq.s32.totalorder %s1549_s27, 0  ;;  %p1176_p10 = scmp.lt.s32.totalorder %s1549_s27, 2 }
  0x38   : > { %s1699_s19 = scalar_select %p33_p1, %s1545_s26, %s35_s14  }
  0x39   : > { %p44_p3 = por %p43_p6, %p42_p2  ;;  %p2029_p5 = scmp.eq.s32.totalorder %s1622_s28, 1 }
  0x3a   : > { %2028 = sst [smem:[#allocation23_spill]] %s1699_s19  ;;  %s1708_s22 = sand.u32 1, %s1545_s26  }
  0x3b   : > { %p1703_p7 = por %p2029_p5, %p42_p2  ;;  %s294_s23 = sand.u32 1, %s1549_s27  }
  0x3c   : > { %p1711_p9 = pnand %p1176_p10, %p44_p3  ;;  %s1995_s11 = sshll.u32 %s1708_s22, 2 }
  0x3d   : > { %s2030_s20 = scalar_select %p1703_p7, 1, 0 }
  0x3e   : > { %s2032_s29 = scalar_select %p1711_p9, 1, 0 }
  0x3f   : > { %2031 = sst [smem:[#allocation24_spill]] %s2030_s20  ;;  %s1996_s15 = sshll.u32 %s1549_s27, 6 }
  0x40   : > { %s2033_s1 = sld [smem:[#allocation25_spill]]  ;;  %s298_s10 = scalar_lea.vmem [#allocation5], %s1995_s11 }
  0x41   : > { %s305_s16 = sshll.u32 %s298_s10, 4  ;;  %s1728_s3 = scalar_lea.sflag [#allocation6], %s294_s23  ;;  %s1726_s16 = int_to_ptr.vmem [resolvable:$true] %s305_s16 }
  0x42   : > { %p1734_p0 = pneg %p1711_p9 }
  0x44   : > { %s2034_s26 = scalar_select %p1734_p0, 1, 0 }
  0x46   : > { %s1722_s18 = scalar_lea.hbm %s2033_s1, %s1996_s15  ;;  %s1330_s11 = scalar_lea.hbm %s2033_s1, 128 }
  0x47   : > { %s1325_s19 = scalar_lea.hbm %s1722_s18, 64  ;;  %p1331_p6 = scmp.lt.u32.totalorder %s1722_s18, %s2033_s1 }
  0x48   : > { %p1326_p12 = scmp.ne.s32.totalorder %s1722_s18, %s1325_s19  ;;  %p1332_p10 = scmp.lt.u32.totalorder %s1330_s11, %s1325_s19 }
  0x49   : > { %p1334_p5 = scmp.lt.u32.totalorder %s1325_s19, %s1722_s18 }
  0x4a   : > { %p1328_p1 = pnand %p1734_p0, %p1326_p12  ;;  %p1333_p3 = por %p1332_p10, %p1331_p6 }
  0x4c   : > { %p1329_p2 = pneg %p1328_p1  ;;  %p1335_p7 = por %p1334_p5, %p1333_p3 }
  0x4e   : > { %p1336_p4 = pnand %p1335_p7, %p1329_p2 }
  0x50   : > { %1339 = shalt.err (!%p1336_p4)
}
  0x51   : > { %s1340_s23 = scalar_lea.vmem %s1726_s16, 64  ;;  %s1554_s14 = smov [#allocation5]  }
  0x52   : > { %p1341_p12 = scmp.ne.s32.totalorder %s1726_s16, %s1340_s23  ;;  %s1345_s17 = sshll.u32 %s1554_s14, 4  ;;  %s1346_s17 = int_to_ptr.vmem [resolvable:$false] %s1345_s17 }
  0x53   : > { %s1347_s15 = scalar_lea.vmem %s1346_s17, 128  ;;  %p1348_p11 = scmp.lt.s32.totalorder %s1726_s16, %s1346_s17 }
  0x54   : > { %p1343_p1 = pnand %p1341_p12, %p1734_p0  ;;  %p1349_p13 = scmp.lt.s32.totalorder %s1347_s15, %s1340_s23 }
  0x56   : > { %p1344_p8 = pneg %p1343_p1  ;;  %p1350_p6 = por %p1349_p13, %p1348_p11 }
  0x58   : > { %p1351_p10 = pnand %p1350_p6, %p1344_p8 }
  0x5a   : > { %1354 = shalt.err (!%p1351_p10)
}
  0x5b   : > { %1165 = dma.hbm_to_vmem [thread:$0]  (!%p1711_p9), %s1722_s18, 64, %s1726_s16, %s1728_s3  }
  0x5c   : > { %s2035_s19 = sshll.u32 %s1549_s27, 6  ;;  %s1555_s1 = smov [#allocation10]  }
  0x5d   : > { %s1763_s14 = scalar_lea.hbm %s1983_s2, %s2035_s19  ;;  %s246_s17 = sshll.u32 %s1555_s1, 4  ;;  %s247_s17 = int_to_ptr.vmem [resolvable:$true] %s246_s17 }
  0x5e   : > { %s1556_s23 = smov [#allocation11]   ;;  %s1355_s24 = scalar_lea.hbm %s1985_s4, 2048 }
  0x5f   : > { %s259_s15 = sshll.u32 %s1556_s23, 4  ;;  %p1356_p4 = scmp.ne.s32.totalorder %s1985_s4, %s1355_s24  ;;  %s260_s15 = int_to_ptr.vmem [resolvable:$true] %s259_s15 }
  0x60   : > { %p2036_p8 = scmp.ne.s32.totalorder %s2027_s21, 0  ;;  %p1362_p7 = scmp.lt.u32.totalorder %s1355_s24, %s1985_s4 }
  0x62   : > { %p1358_p11 = pnand %p1356_p4, %p2036_p8 }
  0x64   : > { %p1359_p13 = pneg %p1358_p11 }
  0x66   : > { %p1364_p2 = pnand %p1362_p7, %p1359_p13 }
  0x68   : > { %1367 = shalt.err (!%p1364_p2)
}
  0x69   : > { %s1368_s1 = scalar_lea.vmem %s247_s17, 2048  ;;  %p1376_p1 = scmp.lt.s32.totalorder %s247_s17, %s247_s17 }
  0x6a   : > { %p1369_p3 = scmp.ne.s32.totalorder %s247_s17, %s1368_s1  ;;  %p1377_p6 = scmp.lt.s32.totalorder %s1368_s1, %s1368_s1 }
  0x6c   : > { %p1371_p5 = pnand %p1369_p3, %p2036_p8  ;;  %p1378_p10 = por %p1377_p6, %p1376_p1 }
  0x6e   : > { %p1372_p12 = pneg %p1371_p5 }
  0x70   : > { %p1379_p9 = pnand %p1378_p10, %p1372_p12 }
  0x72   : > { %1382 = shalt.err (!%p1379_p9)
}
  0x73   : > { %p2037_p4 = scmp.ne.s32.totalorder %s2024_s12, 0  ;;  %s2038_s7 = smov 8  }
  0x74   : > { %s2039_s8 = smov 128   ;;  %s1383_s11 = scalar_lea.hbm %s1986_s5, 2048 }
  0x75   : > { %1155 = dma.hbm_to_vmem [thread:$0]  (!%p2037_p4), %s1985_s4, 2048, %s247_s17, [#allocation9], %s2039_s8, %s2039_s8, %s2038_s7  }
  0x76   : > { %p1384_p11 = scmp.ne.s32.totalorder %s1986_s5, %s1383_s11  ;;  %p1390_p7 = scmp.lt.u32.totalorder %s1383_s11, %s1986_s5 }
  0x78   : > { %p1386_p9 = pnand %p1384_p11, %p2036_p8 }
  0x7a   : > { %p1387_p13 = pneg %p1386_p9 }
  0x7c   : > { %p1392_p2 = pnand %p1390_p7, %p1387_p13 }
  0x7e   : > { %1395 = shalt.err (!%p1392_p2)
}
  0x7f   : > { %s1396_s1 = scalar_lea.vmem %s260_s15, 2048  ;;  %p1404_p1 = scmp.lt.s32.totalorder %s260_s15, %s260_s15 }
  0x80   : > { %p1397_p3 = scmp.ne.s32.totalorder %s260_s15, %s1396_s1  ;;  %p1405_p6 = scmp.lt.s32.totalorder %s1396_s1, %s1396_s1 }
  0x82   : > { %p1399_p5 = pnand %p1397_p3, %p2036_p8  ;;  %p1406_p10 = por %p1405_p6, %p1404_p1 }
  0x84   : > { %p1400_p12 = pneg %p1399_p5 }
  0x86   : > { %p1407_p0 = pnand %p1406_p10, %p1400_p12 }
  0x88   : > { %1410 = shalt.err (!%p1407_p0)
}
  0x89   : > { %1158 = dma.hbm_to_vmem [thread:$0]  (!%p2037_p4), %s1986_s5, 2048, %s260_s15, [#allocation12], %s2039_s8, %s2039_s8, %s2038_s7  }
  0x8a   : > { %s1063_s21 = sshll.u32 %s1708_s22, 3  ;;  %s1064_s24 = sshll.u32 %s1549_s27, 7 }
  0x8b   : > { %s1812_s11 = scalar_lea.hbm %s1981_s0, %s1064_s24  ;;  %s280_s12 = scalar_lea.vmem [#allocation2], %s1063_s21 }
  0x8c   : > { %s287_s10 = sshll.u32 %s280_s12, 4  ;;  %s2040_s23 = sshll.u32 %s1708_s22, 2  ;;  %s1816_s10 = int_to_ptr.vmem [resolvable:$true] %s287_s10 }
  0x8d   : > { %s316_s16 = scalar_lea.vmem [#allocation7], %s2040_s23  ;;  %s277_s15 = scalar_lea.sflag [#allocation3], %s1708_s22 }
  0x8e   : > { %s323_s18 = sshll.u32 %s316_s16, 4  ;;  %s1411_s7 = scalar_lea.hbm %s1812_s11, 128  ;;  %s1818_s18 = int_to_ptr.vmem [resolvable:$true] %s323_s18 }
  0x8f   : > { %p1412_p0 = scmp.ne.s32.totalorder %s1812_s11, %s1411_s7  ;;  %p2041_p8 = scmp.ne.s32.totalorder %s2034_s26, 0 }
  0x90   : > { %s1416_s17 = scalar_lea.hbm %s1981_s0, 256  ;;  %p1417_p9 = scmp.lt.u32.totalorder %s1812_s11, %s1981_s0 }
  0x91   : > { %p1414_p4 = pnand %p1412_p0, %p2041_p8  ;;  %p1418_p13 = scmp.lt.u32.totalorder %s1416_s17, %s1411_s7 }
  0x92   : > { %p1420_p2 = scmp.lt.u32.totalorder %s1411_s7, %s1812_s11 }
  0x93   : > { %p1415_p11 = pneg %p1414_p4  ;;  %p1419_p7 = por %p1418_p13, %p1417_p9 }
  0x95   : > { %p1421_p3 = por %p1420_p2, %p1419_p7 }
  0x97   : > { %p1422_p5 = pnand %p1421_p3, %p1415_p11 }
  0x99   : > { %1425 = shalt.err (!%p1422_p5)
}
  0x9a   : > { %s1426_s22 = scalar_lea.vmem %s1816_s10, 128  ;;  %s1557_s24 = smov [#allocation2]  }
  0x9b   : > { %p1427_p12 = scmp.ne.s32.totalorder %s1816_s10, %s1426_s22  ;;  %s1431_s20 = sshll.u32 %s1557_s24, 4  ;;  %s1432_s20 = int_to_ptr.vmem [resolvable:$false] %s1431_s20 }
  0x9c   : > { %s1433_s19 = scalar_lea.vmem %s1432_s20, 256  ;;  %p1434_p10 = scmp.lt.s32.totalorder %s1816_s10, %s1432_s20 }
  0x9d   : > { %p1429_p1 = pnand %p1427_p12, %p2041_p8  ;;  %p1435_p0 = scmp.lt.s32.totalorder %s1433_s19, %s1426_s22 }
  0x9f   : > { %p1430_p6 = pneg %p1429_p1  ;;  %p1436_p4 = por %p1435_p0, %p1434_p10 }
  0xa1   : > { %p1437_p9 = pnand %p1436_p4, %p1430_p6 }
  0xa3   : > { %1440 = shalt.err (!%p1437_p9)
}
  0xa4   : > { %p2042_p11 = scmp.ne.s32.totalorder %s2032_s29, 0  ;;  %s1441_s12 = scalar_lea.hbm %s1763_s14, 64 }
  0xa5   : > { %p1442_p13 = scmp.ne.s32.totalorder %s1763_s14, %s1441_s12  ;;  %s1446_s7 = scalar_lea.hbm %s1983_s2, 128 }
  0xa6   : > { %1162 = dma.hbm_to_vmem [thread:$0]  (!%p2042_p11), %s1812_s11, 128, %s1816_s10, %s277_s15  }
  0xa7   : > { %p1444_p7 = pnand %p1442_p13, %p2041_p8  ;;  %p1447_p3 = scmp.lt.u32.totalorder %s1763_s14, %s1983_s2 }
  0xa8   : > { %p1448_p5 = scmp.lt.u32.totalorder %s1446_s7, %s1441_s12  ;;  %p1450_p1 = scmp.lt.u32.totalorder %s1441_s12, %s1763_s14 }
  0xa9   : > { %p1445_p2 = pneg %p1444_p7 }
  0xaa   : > { %p1449_p12 = por %p1448_p5, %p1447_p3 }
  0xac   : > { %p1451_p6 = por %p1450_p1, %p1449_p12 }
  0xae   : > { %p1452_p10 = pnand %p1451_p6, %p1445_p2 }
  0xb0   : > { %1455 = shalt.err (!%p1452_p10)
}
  0xb1   : > { %s1456_s11 = scalar_lea.vmem %s1818_s18, 64  ;;  %s1558_s10 = smov [#allocation7]  }
  0xb2   : > { %p1457_p0 = scmp.ne.s32.totalorder %s1818_s18, %s1456_s11  ;;  %s1461_s15 = sshll.u32 %s1558_s10, 4  ;;  %s1462_s15 = int_to_ptr.vmem [resolvable:$false] %s1461_s15 }
  0xb3   : > { %s1463_s17 = scalar_lea.vmem %s1462_s15, 128  ;;  %p1464_p13 = scmp.lt.s32.totalorder %s1818_s18, %s1462_s15 }
  0xb4   : > { %p1459_p4 = pnand %p1457_p0, %p2041_p8  ;;  %p1465_p7 = scmp.lt.s32.totalorder %s1463_s17, %s1456_s11 }
  0xb6   : > { %p1460_p9 = pneg %p1459_p4  ;;  %p1466_p3 = por %p1465_p7, %p1464_p13 }
  0xb8   : > { %p1467_p5 = pnand %p1466_p3, %p1460_p9 }
  0xba   : > { %1470 = shalt.err (!%p1467_p5)
}
  0xbb   : > { %1168 = dma.hbm_to_vmem [thread:$0]  (!%p2042_p11), %s1763_s14, 64, %s1818_s18, %s1728_s3  }
  0xbc   : > { %p2043_p2 = scmp.ne.s32.totalorder %s2023_s9, 0 }
  0xbd   : > { %s1867_s26 = sand.u32 (!%p2043_p2), 1, %s1541_s25   ;;  %p2044_p8 = scmp.ne.s32.totalorder (!%p2043_p2), %s2020_s30, 0 }
  0xbe   : > { %332 = sbr.rel (%p2043_p2) target bundleno = 987 (0x3db), region = 48  ;;  %s1070_s13 = sshll.u32 (!%p2043_p2), %s1867_s26, 3 }
  0xbf   : > { %s335_s21 = scalar_lea.sflag (!%p2043_p2), [#allocation3], %s1867_s26  ;;  %s1873_s22 = scalar_lea.vmem (!%p2043_p2), [#allocation2], %s1070_s13 }
  0xc5   : > { %1516 = dma.done.wait (%p2044_p8), %s335_s21, 128  }
  0xc6   : > { %1518 = vsyncadd (%p2044_p8), %s335_s21, 4294967168  ;;  %s343_s3 = sand.u32 1, %s1622_s28   ;;  %s1071_s9 = sshll.u32 %s1867_s26, 2 }
  0xc7   : > { %s344_s29 = scalar_lea.sflag [#allocation6], %s343_s3  ;;  %s1881_s14 = scalar_lea.vmem [#allocation5], %s1071_s9 }
  0xc8   : > { %1520 = dma.done.wait (%p2044_p8), %s344_s29, 128  }
  0xc9   : > { %1522 = vsyncadd (%p2044_p8), %s344_s29, 4294967168  ;;  %s1887_s18 = scalar_lea.vmem [#allocation7], %s1071_s9  ;;  %p2045_p11 = scmp.eq.s32.totalorder %s1622_s28, 0 }
  0xcb   : > { %1524 = dma.done.wait (%p2045_p11), [#allocation9], 4096   ;;  %p2046_p12 = pmov %p2045_p11 }
  0xcc   : > { %p2047_p1 = pmov %p2045_p11 }
  0xcd   : > { %1526 = vsyncadd (%p2046_p12), [#allocation9], 4294963200 }
  0xce   : > { %1528 = dma.done.wait (%p2047_p1), [#allocation12], 2048   ;;  %p2048_p6 = pmov %p2047_p1 }
  0xcf   : > { %v1559_v0 = vmov 0   ;;  %v1219_v1 = vld [vmem:[#allocation8 + $0x4] ss:$8 sps:$4 sm:$0xff]   ;;  %v1221_v2 = vld [vmem:[#allocation8] ss:$8 sps:$4 sm:$0xff]   ;;  %v689_v54 = vlaneseq  ;;  %s2049_s20 = sld [smem:[#allocation24_spill]] }
  0xd0   : > { %1530 = vsyncadd (%p2048_p6), [#allocation12], 4294965248  ;;  %541 = vmatprep.mubr.bf16.mxu0 %v1559_v0  ;;  %679 = vmatprep.mubr.bf16.mxu1 %v1559_v0  ;;  %v1222_v3 = vld [vmem:[#allocation10 + $0x4] ss:$8 sps:$4 sm:$0xff]   ;;  %v1224_v4 = vld [vmem:[#allocation10] ss:$8 sps:$4 sm:$0xff]  }
  0xd1   : > { %509 = vmatprep.subr.bf16.mxu0 %v1219_v1  ;;  %v1225_v5 = vld [vmem:[#allocation8 + $0x14] ss:$8 sps:$4 sm:$0xff]   ;;  %v1227_v6 = vld [vmem:[#allocation8 + $0x10] ss:$8 sps:$4 sm:$0xff]   ;;  %647 = vmatprep.subr.bf16.mxu1 %v1222_v3  ;;  %v1231_v9 = vld [vmem:[#allocation8 + $0x24] ss:$8 sps:$4 sm:$0xff]  }
  0xd2   : > { %510 = vmatpush1.bf16.msra.mxu0 %v1221_v2  ;;  %v1228_v7 = vld [vmem:[#allocation10 + $0x14] ss:$8 sps:$4 sm:$0xff]   ;;  %648 = vmatpush1.bf16.msra.mxu1 %v1224_v4  ;;  %v1230_v8 = vld [vmem:[#allocation10 + $0x10] ss:$8 sps:$4 sm:$0xff]   ;;  %v1233_v10 = vld [vmem:[#allocation8 + $0x20] ss:$8 sps:$4 sm:$0xff]  }
  0xd3   : > { %511 = vmatprep.subr.bf16.mxu0 %v1225_v5  ;;  %649 = vmatprep.subr.bf16.mxu1 %v1228_v7  ;;  %v1234_v11 = vld [vmem:[#allocation10 + $0x24] ss:$8 sps:$4 sm:$0xff]   ;;  %v1237_v12 = vld [vmem:[#allocation8 + $0x34] ss:$8 sps:$4 sm:$0xff]   ;;  %v1236_v13 = vld [vmem:[#allocation10 + $0x20] ss:$8 sps:$4 sm:$0xff]  }
  0xd4   : > { %v1240_v14 = vld [vmem:[#allocation10 + $0x34] ss:$8 sps:$4 sm:$0xff]   ;;  %v1239_v15 = vld [vmem:[#allocation8 + $0x30] ss:$8 sps:$4 sm:$0xff]   ;;  %v1243_v16 = vld [vmem:[#allocation8 + $0x44] ss:$8 sps:$4 sm:$0xff]  }
  0xd5   : > { %v1242_v17 = vld [vmem:[#allocation10 + $0x30] ss:$8 sps:$4 sm:$0xff]   ;;  %v1246_v18 = vld [vmem:[#allocation10 + $0x44] ss:$8 sps:$4 sm:$0xff]   ;;  %v1245_v19 = vld [vmem:[#allocation8 + $0x40] ss:$8 sps:$4 sm:$0xff]  }
  0xd6   : > { %512 = vmatpush1.bf16.msra.mxu0 %v1227_v6  ;;  %650 = vmatpush1.bf16.msra.mxu1 %v1230_v8  ;;  %v1249_v20 = vld [vmem:[#allocation8 + $0x54] ss:$8 sps:$4 sm:$0xff]   ;;  %v1248_v21 = vld [vmem:[#allocation10 + $0x40] ss:$8 sps:$4 sm:$0xff]   ;;  %v1251_v23 = vld [vmem:[#allocation8 + $0x50] ss:$8 sps:$4 sm:$0xff]  }
  0xd7   : > { %513 = vmatprep.subr.bf16.mxu0 %v1231_v9  ;;  %651 = vmatprep.subr.bf16.mxu1 %v1234_v11  ;;  %v1252_v22 = vld [vmem:[#allocation10 + $0x54] ss:$8 sps:$4 sm:$0xff]   ;;  %v1255_v24 = vld [vmem:[#allocation8 + $0x64] ss:$8 sps:$4 sm:$0xff]   ;;  %v1254_v25 = vld [vmem:[#allocation10 + $0x50] ss:$8 sps:$4 sm:$0xff]  }
  0xd8   : > { %v1258_v26 = vld [vmem:[#allocation10 + $0x64] ss:$8 sps:$4 sm:$0xff]   ;;  %v1257_v27 = vld [vmem:[#allocation8 + $0x60] ss:$8 sps:$4 sm:$0xff]   ;;  %v1261_v28 = vld [vmem:[#allocation8 + $0x74] ss:$8 sps:$4 sm:$0xff]  }
  0xd9   : > { %v1260_v29 = vld [vmem:[#allocation10 + $0x60] ss:$8 sps:$4 sm:$0xff]   ;;  %v1263_v30 = vld [vmem:[#allocation8 + $0x70] ss:$8 sps:$4 sm:$0xff]   ;;  %v1264_v31 = vld [vmem:[#allocation10 + $0x74] ss:$8 sps:$4 sm:$0xff]  }
  0xda   : > { %514 = vmatpush1.bf16.msra.mxu0 %v1233_v10  ;;  %652 = vmatpush1.bf16.msra.mxu1 %v1236_v13  ;;  %v1900_v32 = vld [vmem:[%s1873_s22] sm:$0xff]  ;;  %v1266_v34 = vld [vmem:[#allocation10 + $0x70] ss:$8 sps:$4 sm:$0xff]   ;;  %v1272_v37 = vld [vmem:[#allocation11 + $0x14] ss:$8 sps:$4 sm:$0xff]   ;;  %v1909_v55 = vshrl.u32 %v689_v54, 7 }
  0xdb   : > { %515 = vmatprep.subr.bf16.mxu0 %v1237_v12  ;;  %653 = vmatprep.subr.bf16.mxu1 %v1240_v14  ;;  %v1269_v33 = vld [vmem:[#allocation11 + $0x4] ss:$8 sps:$4 sm:$0xff]   ;;  %v411_v35 = vpack.c.bf16 %v1900_v32, %v1900_v32  ;;  %v1267_v36 = vld [vmem:[#allocation11] ss:$8 sps:$4 sm:$0xff]   ;;  %v550_v38 = vld [vmem:[%s1881_s14] sm:$0xf]  ;;  %v853_v53 = vmul.f32 %v1900_v32, %v1900_v32 }
  0xdc   : > { %v1270_v39 = vld [vmem:[#allocation11 + $0x10] ss:$8 sps:$4 sm:$0xff]   ;;  %v1275_v40 = vld [vmem:[#allocation11 + $0x24] ss:$8 sps:$4 sm:$0xff]   ;;  %v1273_v41 = vld [vmem:[#allocation11 + $0x20] ss:$8 sps:$4 sm:$0xff]  }
  0xdd   : > { %v1278_v42 = vld [vmem:[#allocation11 + $0x34] ss:$8 sps:$4 sm:$0xff]   ;;  %v1276_v43 = vld [vmem:[#allocation11 + $0x30] ss:$8 sps:$4 sm:$0xff]   ;;  %v1281_v44 = vld [vmem:[#allocation11 + $0x44] ss:$8 sps:$4 sm:$0xff]   ;;  %854 = vadd.xlane.f32.xlu0 %v853_v53 }
  0xde   : > { %516 = vmatpush1.bf16.msra.mxu0 %v1239_v15  ;;  %654 = vmatpush1.bf16.msra.mxu1 %v1242_v17  ;;  %v1279_v45 = vld [vmem:[#allocation11 + $0x40] ss:$8 sps:$4 sm:$0xff]   ;;  %v1284_v46 = vld [vmem:[#allocation11 + $0x54] ss:$8 sps:$4 sm:$0xff]   ;;  %v1282_v47 = vld [vmem:[#allocation11 + $0x50] ss:$8 sps:$4 sm:$0xff]  }
  0xdf   : > { %517 = vmatprep.subr.bf16.mxu0 %v1243_v16  ;;  %655 = vmatprep.subr.bf16.mxu1 %v1246_v18  ;;  %v1287_v48 = vld [vmem:[#allocation11 + $0x64] ss:$8 sps:$4 sm:$0xff]   ;;  %v1285_v49 = vld [vmem:[#allocation11 + $0x60] ss:$8 sps:$4 sm:$0xff]   ;;  %v1290_v50 = vld [vmem:[#allocation11 + $0x74] ss:$8 sps:$4 sm:$0xff]  }
  0xe0   : > { %v1288_v51 = vld [vmem:[#allocation11 + $0x70] ss:$8 sps:$4 sm:$0xff]   ;;  %v691_v56 = vsub.s32 0, %v1909_v55  ;;  %v697_v57 = vsub.s32 2, %v1909_v55  ;;  %v1916_v58 = vld [vmem:[%s1987_s6] sm:$0xff]  ;;  %v842_v10 = vsub.s32 1, %v1909_v55 }
  0xe1   : > { %v701_v52 = vld [vmem:[%s1887_s18] sm:$0xf]  ;;  %v848_v11 = vsub.s32 3, %v1909_v55  ;;  %s1126_s19 = sshll.u32 %s1622_s28, 7  ;;  %s408_s12 = scalar_lea.vmem [#allocation13], %s1070_s13 }
  0xe2   : > { %518 = vmatpush1.bf16.msra.mxu0 %v1245_v19  ;;  %656 = vmatpush1.bf16.msra.mxu1 %v1248_v21  ;;  %v692_v61 = vrot.slane %v1916_v58, %v691_v56  ;;  %v698_v62 = vrot.slane %v1916_v58, %v697_v57  ;;  %v843_v12 = vrot.slane %v1916_v58, %v842_v10  ;;  %s915_s23 = sshll.u32 %s408_s12, 4  ;;  %s2050_s8 = sld [smem:[#allocation27_spill]]  ;;  %s1939_s23 = int_to_ptr.vmem [resolvable:$true] %s915_s23 }
  0xe3   : > { %519 = vmatprep.subr.bf16.mxu0 %v1249_v20  ;;  %657 = vmatprep.subr.bf16.mxu1 %v1252_v22  ;;  %v849_v16 = vrot.slane %v1916_v58, %v848_v11  ;;  %s902_s11 = scalar_lea.sflag [#allocation4], %s1867_s26  ;;  %s1471_s10 = scalar_lea.vmem %s1939_s23, 128 }
  0xe4   : > { %p1472_p10 = scmp.ne.s32.totalorder %s1939_s23, %s1471_s10  ;;  %p2051_p0 = scmp.ne.s32.totalorder %s2049_s20, 0 }
  0xe5   : > { %s1560_s28 = smov [#allocation13]  }
  0xe6   : > { %520 = vmatpush1.bf16.msra.mxu0 %v1251_v23  ;;  %658 = vmatpush1.bf16.msra.mxu1 %v1254_v25  ;;  %p1473_p4 = pnand %p1472_p10, %p2051_p0  ;;  %s1475_s15 = sshll.u32 %s1560_s28, 4  ;;  %s1476_s15 = int_to_ptr.vmem [resolvable:$false] %s1475_s15 }
  0xe7   : > { %521 = vmatprep.subr.bf16.mxu0 %v1255_v24  ;;  %659 = vmatprep.subr.bf16.mxu1 %v1258_v26  ;;  %s1477_s17 = scalar_lea.vmem %s1476_s15, 256  ;;  %p1478_p13 = scmp.lt.s32.totalorder %s1939_s23, %s1476_s15 }
  0xe8   : > { %s1937_s1 = scalar_lea.hbm %s2050_s8, %s1126_s19  ;;  %p1474_p9 = pneg %p1473_p4 }
  0xe9   : > { %p1479_p7 = scmp.lt.s32.totalorder %s1477_s17, %s1471_s10 }
  0xea   : > { %522 = vmatpush1.bf16.msra.mxu0 %v1257_v27  ;;  %660 = vmatpush1.bf16.msra.mxu1 %v1260_v29 }
  0xeb   : > { %523 = vmatprep.subr.bf16.mxu0 %v1261_v28  ;;  %661 = vmatprep.subr.bf16.mxu1 %v1264_v31  ;;  %p1480_p3 = por %p1479_p7, %p1478_p13 }
  0xed   : > { %p1481_p5 = pnand %p1480_p3, %p1474_p9 }
  0xee   : > { %524 = vmatpush1.bf16.msra.mxu0 %v1263_v30  ;;  %662 = vmatpush1.bf16.msra.mxu1 %v1266_v34 }
  0xef   : > { %798 = vmatprep.subr.bf16.mxu0 %v1269_v33 }
  0xf1   : > { %542 = vmatmul.mubr.bf16.vlgmr.msra.gmra.mrb[0].mxu0 %v411_v35  ;;  %680 = vmatmul.mubr.bf16.vlgmr.msra.gmra.mrb[0].mxu1 %v550_v38 }
  0xf2   : > { %799 = vmatpush1.bf16.msra.mxu0 %v1267_v36  ;;  %830 = vmatprep.mubr.bf16.mxu0 %v1559_v0 }
  0xf3   : > { %800 = vmatprep.subr.bf16.mxu0 %v1272_v37 }
  0xf6   : > { %801 = vmatpush1.bf16.msra.mxu0 %v1270_v39 }
  0xf7   : > { %802 = vmatprep.subr.bf16.mxu0 %v1275_v40 }
  0xfa   : > { %803 = vmatpush1.bf16.msra.mxu0 %v1273_v41  ;;  %v880_v41 = vsub.s32 6, %v1909_v55 }
  0xfb   : > { %804 = vmatprep.subr.bf16.mxu0 %v1278_v42 }
  0xfe   : > { %805 = vmatpush1.bf16.msra.mxu0 %v1276_v43 }
  0xff   : > { %806 = vmatprep.subr.bf16.mxu0 %v1281_v44  ;;  %v881_v44 = vrot.slane %v1916_v58, %v880_v41 }
 0x102   : > { %807 = vmatpush1.bf16.msra.mxu0 %v1279_v45 }
 0x103   : > { %808 = vmatprep.subr.bf16.mxu0 %v1284_v46 }
 0x106   : > { %809 = vmatpush1.bf16.msra.mxu0 %v1282_v47 }
 0x107   : > { %810 = vmatprep.subr.bf16.mxu0 %v1287_v48 }
 0x10a   : > { %811 = vmatpush1.bf16.msra.mxu0 %v1285_v49 }
 0x10b   : > { %812 = vmatprep.subr.bf16.mxu0 %v1290_v50 }
 0x10e   : > { %813 = vmatpush1.bf16.msra.mxu0 %v1288_v51  ;;  %v897_v51 = vsub.s32 5, %v1909_v55 }
 0x110   : > { %v898_v56 = vrot.slane %v1916_v58, %v897_v51 }
 0x111   : > { %831 = vmatmul.mubr.bf16.vlgmr.msra.gmra.mrb[4].mxu0 %v701_v52 }
 0x16a   : > { %v855_v25 = vpop.xlane.xlu0 %854 }
 0x16b   : > { %v859_v26 = vadd.f32 1e-06, %v855_v25 }
 0x16d   : > { %1291 = vrsqrt.f32 %v859_v26  ;;  %vm862_vm0 = vcmp.eq.f32.partialorder %v859_v26, inf  ;;  %v865_v31 = vand.u32 2147483648, %v859_v26  ;;  %vm864_vm1 = vcmp.eq.f32.partialorder %v859_v26, 0.0 }
 0x177   : > { %v1292_v27 = vpop.eup %1291 }
 0x178   : > { %v861_v30 = vmul.f32 %v1292_v27, %v859_v26 }
 0x17a   : > { %v863_v33 = vsel %vm862_vm0, %v859_v26, %v861_v30 }
 0x17b   : > { %v866_v34 = vsel %vm864_vm1, %v865_v31, %v863_v33 }
 0x17c   : > { %v867_v35 = vmul.f32 0.5, %v866_v34 }
 0x1c4   : > { %v543_v59 = vpop.f32.mrb[0].mxu0  ;;  %v681_v63 = vpop.f32.mrb[0].mxu1 }
 0x1c5   : > { %v545_v60 = vpop.f32.mrb[1].mxu0  ;;  %v688_v1 = vadd.f32 %v681_v63, %v543_v59  ;;  %v683_v3 = vpop.f32.mrb[1].mxu1 }
 0x1c6   : > { %v547_v0 = vpop.f32.mrb[2].mxu0  ;;  %v685_v4 = vpop.f32.mrb[2].mxu1  ;;  %v699_v6 = vadd.f32 %v698_v62, %v683_v3 }
 0x1c7   : > { %v548_v2 = vpop.f32.mrb[3].mxu0  ;;  %v693_v5 = vadd.f32 %v692_v61, %v688_v1  ;;  %v686_v7 = vpop.f32.mrb[3].mxu1 }
 0x1c9   : > { %v694_v8 = vmax.f32 %v693_v5, 0.0 }
 0x1cb   : > { %v700_v9 = vmul.f32 %v699_v6, %v694_v8 }
 0x1e4   : > { %v832_v13 = vpop.f32.mrb[4].mxu0 }
 0x1e5   : > { %v839_v14 = vadd.f32 %v832_v13, %v545_v60  ;;  %v834_v15 = vpop.f32.mrb[5].mxu0 }
 0x1e6   : > { %v836_v17 = vpop.f32.mrb[6].mxu0  ;;  %v850_v21 = vadd.f32 %v849_v16, %v834_v15 }
 0x1e7   : > { %v844_v18 = vadd.f32 %v843_v12, %v839_v14  ;;  %v837_v19 = vpop.f32.mrb[7].mxu0 }
 0x1e9   : > { %v845_v20 = vmax.f32 %v844_v18, 0.0 }
 0x1eb   : > { %v851_v22 = vmul.f32 %v850_v21, %v845_v20 }
 0x1ed   : > { %v852_v23 = vadd.f32 %v851_v22, %v700_v9 }
 0x1ef   : > { %v856_v24 = vmul.f32 %v852_v23, %v852_v23 }
 0x1f1   : > { %857 = vadd.xlane.f32.xlu0 %v856_v24 }
 0x27e   : > { %v858_v28 = vpop.xlane.xlu0 %857 }
 0x27f   : > { %v868_v29 = vadd.f32 1e-06, %v858_v28 }
 0x281   : > { %1293 = vrsqrt.f32 %v868_v29 }
 0x28b   : > { %v1294_v36 = vpop.eup %1293 }
 0x28c   : > { %v870_v37 = vmul.f32 %v1294_v36, %v867_v35 }
 0x28e   : > { %v871_v38 = vmin.f32 %v870_v37, 1.0 }
 0x290   : > { %v872_v39 = vmul.f32 %v871_v38, %v852_v23 }
 0x292   : > { %v873_v40 = vadd.f32 %v872_v39, %v1900_v32  ;;  %v892_v32 = vsub.s32 4, %v1909_v55 }
 0x294   : > { %874 = vadd.xlane.f32.xlu1 %v873_v40  ;;  %v893_v52 = vrot.slane %v1916_v58, %v892_v32 }
 0x321   : > { %v875_v42 = vpop.xlane.xlu1 %874 }
 0x322   : > { %v876_v43 = vmul.f32 0.03125, %v875_v42 }
 0x324   : > { %v877_v45 = vsub.f32 %v873_v40, %v876_v43 }
 0x326   : > { %v882_v46 = vmul.f32 %v881_v44, %v877_v45 }
 0x328   : > { %v883_v47 = vmul.f32 %v882_v46, %v882_v46 }
 0x32a   : > { %884 = vadd.xlane.f32.xlu1 %v883_v47 }
 0x3b7   : > { %v885_v48 = vpop.xlane.xlu1 %884 }
 0x3b8   : > { %v886_v49 = vmul.f32 0.03125, %v885_v48 }
 0x3ba   : > { %v887_v50 = vadd.f32 1e-05, %v886_v49 }
 0x3bc   : > { %1295 = vrsqrt.f32 %v887_v50 }
 0x3c6   : > { %v1296_v53 = vpop.eup %1295 }
 0x3c7   : > { %v889_v54 = vmul.f32 %v1296_v53, %v882_v46 }
 0x3c9   : > { %v894_v57 = vmul.f32 %v893_v52, %v889_v54 }
 0x3cb   : > { %v899_v59 = vadd.f32 %v898_v56, %v894_v57 }
 0x3cd   : > { %900 = vst [vmem:[%s408_s12] sm:$0xff] %v899_v59 }
 0x3ce   : > { %1484 = shalt.err (!%p1481_p5)
}
 0x3cf   : > { %s1485_s26 = scalar_lea.hbm %s1937_s1, 128  ;;  %s1489_s22 = scalar_lea.hbm %s2050_s8, 256 }
 0x3d0   : > { %p1486_p2 = scmp.ne.s32.totalorder %s1937_s1, %s1485_s26  ;;  %p1490_p12 = scmp.lt.u32.totalorder %s1937_s1, %s2050_s8 }
 0x3d1   : > { %p1491_p1 = scmp.lt.u32.totalorder %s1489_s22, %s1485_s26  ;;  %p1493_p10 = scmp.lt.u32.totalorder %s1485_s26, %s1937_s1 }
 0x3d2   : > { %p1487_p8 = pnand %p1486_p2, %p2051_p0 }
 0x3d3   : > { %p1492_p6 = por %p1491_p1, %p1490_p12 }
 0x3d4   : > { %p1488_p11 = pneg %p1487_p8 }
 0x3d5   : > { %p1494_p4 = por %p1493_p10, %p1492_p6 }
 0x3d7   : > { %p1495_p9 = pnand %p1494_p4, %p1488_p11 }
 0x3d9   : > { %1498 = shalt.err (!%p1495_p9)
}
 0x3da   : > { %1147 = dma.vmem_to_hbm [thread:$0]  (%p2051_p0), %s1939_s23, 128, %s1937_s1, %s902_s11  }
 0x3db PF: > { %s2052_s29 = sld [smem:[#allocation19_spill]]  ;;  %s2053_s14 = sld [smem:[#allocation21_spill]] }
 0x3dc   : > { %p2055_p7 = scmp.ge.s32.totalorder %s1549_s27, 2 }
 0x3e1   : > { %s927_s18 = sand.u32 1, %s2052_s29   ;;  %p2054_p13 = scmp.ne.s32.totalorder %s2053_s14, 0 }
 0x3e2   : > { %s928_s30 = scalar_lea.sflag [#allocation4], %s927_s18 }
 0x3e3   : > { %p1170_p3 = pnand %p2055_p7, %p2054_p13 }
 0x3e5   : > { %1532 = dma.done.wait (!%p1170_p3), %s928_s30, 128  }
 0x3e6   : > { %1534 = vsyncadd (!%p1170_p3), %s928_s30, 4294967168  ;;  %s2056_s27 = sld [smem:[#allocation22_spill]]  ;;  %s2057_s19 = sld [smem:[#allocation20_spill]] }
 0x3e7   : > { %s2058_s26 = sld [smem:[#allocation23_spill]]  ;;  %s2059_s24 = smov %s1541_s25 }
 0x3ec   : > { %p25_p5 = scmp.ge.s32.totalorder %s2056_s27, 4   ;;  %s2060_s25 = smov %s2057_s19 }
 0x3ee   :  { %27 = sbr.rel (!%p25_p5) target bundleno = 13 (0xd), region = 129 }
 0x3f5   :  { %933 = vsyncpa [#allocation3], 1 }
 0x3f6   :  { %935 = vsyncpa [#allocation3 + $0x1], 1 }
 0x3f7   :  { %936 = vsyncpa [#allocation6], 1 }
 0x3f8   :  { %938 = vsyncpa [#allocation6 + $0x1], 1 }
 0x3f9   :  { %939 = vsyncpa [#allocation9], 1 }
 0x3fa   :  { %940 = vsyncpa [#allocation12], 1 }
 0x3fb   :  { %941 = vsyncpa [#allocation4], 1 }
 0x3fc   :  { %943 = vsyncpa [#allocation4 + $0x1], 1 }

// kernel: tpu_custom_call.1
= control target key start
LH: loop header
LB: loop body
LE: loop exit
PB: predicated region body
PF: predicated region fallthrough
CT: control target
= control target key end

     0   :  { %s1981_s0 = inlined_call_operand.hbm [shape: f32[16,128], index: 0, kind: input, shape index: {}]   ;;  %s1982_s1 = inlined_call_operand.hbm [shape: bf16[16,128], index: 1, kind: input, shape index: {}]   ;;  %s1983_s2 = inlined_call_operand.hbm [shape: bf16[16,128], index: 2, kind: input, shape index: {}]   ;;  %s1984_s3 = inlined_call_operand.hbm [shape: bf16[128,256], index: 3, kind: input, shape index: {}]   ;;  %s1985_s4 = inlined_call_operand.hbm [shape: bf16[128,256], index: 4, kind: input, shape index: {}]   ;;  %s1986_s5 = inlined_call_operand.hbm [shape: bf16[128,256], index: 5, kind: input, shape index: {}]   ;;  %s1987_s6 = inlined_call_operand.vmem [shape: f32[8,128], index: 6, kind: input, shape index: {}]   ;;  %s1988_s7 = inlined_call_operand.hbm [shape: f32[16,128], index: 7, kind: output, shape index: {}]  }
   0x1   :  { %2015 = sst [smem:[#allocation25_spill]] %s1982_s1 }
   0x2   :  { %2016 = sst [smem:[#allocation26_spill]] %s1984_s3 }
   0x3   :  { %2017 = sst [smem:[#allocation27_spill]] %s1988_s7 }
   0x4   :  { %12 = vsyncpa [#allocation3], 0 }
   0x5   :  { %14 = vsyncpa [#allocation3 + $0x1], 0 }
   0x6   :  { %15 = vsyncpa [#allocation6], 0 }
   0x7   :  { %17 = vsyncpa [#allocation6 + $0x1], 0 }
   0x8   :  { %18 = vsyncpa [#allocation9], 0 }
   0x9   :  { %19 = vsyncpa [#allocation12], 0 }
   0xa   :  { %20 = vsyncpa [#allocation4], 0 }
   0xb   :  { %22 = vsyncpa [#allocation4 + $0x1], 0  ;;  %s1601_s24 = smov 0   ;;  %s1603_s25 = smov 0  }
   0xc   :  { %s1605_s26 = smov 0   ;;  %s1607_s27 = smov 0  }
   0xd LB: > { %2018 = sst [smem:[#allocation19_spill]] %s1537_s24  ;;  %s1622_s28 = sadd.s32 4294967295, %s1549_s27   ;;  %s1549_s27 = sphi %s1607_s27, %s2056_s27   ;;  %s1545_s26 = sphi %s1605_s26, %s2058_s26   ;;  %s1541_s25 = sphi %s1603_s25, %s2060_s25   ;;  %s1537_s24 = sphi %s1601_s24, %s2059_s24  }
   0xe   : > { %2019 = sst [smem:[#allocation20_spill]] %s1545_s26  ;;  %s1057_s29 = sadd.s32 4294967294, %s1549_s27  }
   0xf   : > { %p48_p0 = scmp.ne.s32.totalorder %s1541_s25, %s1537_s24  ;;  %p1989_p1 = scmp.eq.s32.totalorder %s1622_s28, 0 }
  0x10   : > { %p214_p3 = scmp.eq.s32.totalorder %s1057_s29, 1  ;;  %p1058_p5 = scmp.ge.s32.totalorder %s1549_s27, 1 }
  0x11   : > { %p1631_p4 = por %p1989_p1, %p48_p0  ;;  %p221_p7 = scmp.lt.s32.totalorder %s1549_s27, 3 }
  0x12   : > { %p1636_p6 = por %p214_p3, %p48_p0  ;;  %s1551_s10 = smov [#allocation8]  }
  0x13   : > { %s2020_s30 = scalar_select %p1631_p4, 1, 0 }
  0x14   : > { %s2021_s8 = scalar_select %p1636_p6, 1, 0 }
  0x15   : > { %p1641_p8 = pnand %p1058_p5, %p221_p7  ;;  %s233_s11 = sshll.u32 %s1551_s10, 4  ;;  %s1645_s11 = int_to_ptr.vmem [resolvable:$true] %s233_s11 }
  0x16   : > { %2022 = sst [smem:[#allocation21_spill]] %s2021_s8  ;;  %s1657_s13 = sadd.s32 1, %s1549_s27  }
  0x17   : > { %s2023_s9 = scalar_select %p1641_p8, 1, 0 }
  0x18   : > { %p1149_p9 = pneg %p1641_p8  ;;  %2025 = sst [smem:[#allocation22_spill]] %s1657_s13 }
  0x19   : > { %s35_s14 = sadd.s32 1, %s1545_s26  ;;  %s32_s15 = ssub.s32 %s1549_s27, %s1657_s13 }
  0x1a   : > { %p1652_p11 = pnand %p1149_p9, %p1989_p1  ;;  %s2026_s3 = sld [smem:[#allocation26_spill]] }
  0x1c   : > { %s2024_s12 = scalar_select %p1652_p11, 1, 0 }
  0x1d   : > { %p1670_p13 = pneg %p1652_p11 }
  0x1f   : > { %s2027_s21 = scalar_select %p1670_p13, 1, 0 }
  0x20   : > { %s1297_s18 = scalar_lea.hbm %s2026_s3, 2048 }
  0x21   : > { %p1298_p12 = scmp.ne.s32.totalorder %s2026_s3, %s1297_s18  ;;  %p1304_p5 = scmp.lt.u32.totalorder %s1297_s18, %s2026_s3 }
  0x23   : > { %p1300_p0 = pnand %p1670_p13, %p1298_p12 }
  0x25   : > { %p1301_p3 = pneg %p1300_p0 }
  0x27   : > { %p1306_p7 = pnand %p1304_p5, %p1301_p3 }
  0x29   : > { %1309 = shalt.err (!%p1306_p7)
}
  0x2a   : > { %s1310_s29 = scalar_lea.vmem %s1645_s11, 2048  ;;  %p1318_p2 = scmp.lt.s32.totalorder %s1645_s11, %s1645_s11 }
  0x2b   : > { %p1311_p9 = scmp.ne.s32.totalorder %s1645_s11, %s1310_s29  ;;  %p1319_p6 = scmp.lt.s32.totalorder %s1310_s29, %s1310_s29 }
  0x2d   : > { %p1313_p10 = pnand %p1311_p9, %p1670_p13  ;;  %p1320_p12 = por %p1319_p6, %p1318_p2 }
  0x2f   : > { %p1314_p1 = pneg %p1313_p10 }
  0x31   : > { %p1321_p0 = pnand %p1320_p12, %p1314_p1 }
  0x33   : > { %1324 = shalt.err (!%p1321_p0)
}
  0x34   : > { %s1990_s10 = smov 128   ;;  %s1992_s16 = smov 8  }
  0x35   : > { %1152 = dma.hbm_to_vmem [thread:$0]  (!%p1652_p11), %s2026_s3, 2048, %s1645_s11, [#allocation9], %s1990_s10, %s1990_s10, %s1992_s16  }
  0x36   : > { %p33_p1 = scmp.eq.s32.totalorder %s32_s15, 0  ;;  %p42_p2 = scmp.ne.s32.totalorder %s1545_s26, %s1541_s25 }
  0x37   : > { %p43_p6 = scmp.eq.s32.totalorder %s1549_s27, 0  ;;  %p1176_p10 = scmp.lt.s32.totalorder %s1549_s27, 2 }
  0x38   : > { %s1699_s19 = scalar_select %p33_p1, %s1545_s26, %s35_s14  }
  0x39   : > { %p44_p3 = por %p43_p6, %p42_p2  ;;  %p2029_p5 = scmp.eq.s32.totalorder %s1622_s28, 1 }
  0x3a   : > { %2028 = sst [smem:[#allocation23_spill]] %s1699_s19  ;;  %s1708_s22 = sand.u32 1, %s1545_s26  }
  0x3b   : > { %p1703_p7 = por %p2029_p5, %p42_p2  ;;  %s294_s23 = sand.u32 1, %s1549_s27  }
  0x3c   : > { %p1711_p9 = pnand %p1176_p10, %p44_p3  ;;  %s1995_s11 = sshll.u32 %s1708_s22, 2 }
  0x3d   : > { %s2030_s20 = scalar_select %p1703_p7, 1, 0 }
  0x3e   : > { %s2032_s29 = scalar_select %p1711_p9, 1, 0 }
  0x3f   : > { %2031 = sst [smem:[#allocation24_spill]] %s2030_s20  ;;  %s1996_s15 = sshll.u32 %s1549_s27, 6 }
  0x40   : > { %s2033_s1 = sld [smem:[#allocation25_spill]]  ;;  %s298_s10 = scalar_lea.vmem [#allocation5], %s1995_s11 }
  0x41   : > { %s305_s16 = sshll.u32 %s298_s10, 4  ;;  %s1728_s3 = scalar_lea.sflag [#allocation6], %s294_s23  ;;  %s1726_s16 = int_to_ptr.vmem [resolvable:$true] %s305_s16 }
  0x42   : > { %p1734_p0 = pneg %p1711_p9 }
  0x44   : > { %s2034_s26 = scalar_select %p1734_p0, 1, 0 }
  0x46   : > { %s1722_s18 = scalar_lea.hbm %s2033_s1, %s1996_s15  ;;  %s1330_s11 = scalar_lea.hbm %s2033_s1, 128 }
  0x47   : > { %s1325_s19 = scalar_lea.hbm %s1722_s18, 64  ;;  %p1331_p6 = scmp.lt.u32.totalorder %s1722_s18, %s2033_s1 }
  0x48   : > { %p1326_p12 = scmp.ne.s32.totalorder %s1722_s18, %s1325_s19  ;;  %p1332_p10 = scmp.lt.u32.totalorder %s1330_s11, %s1325_s19 }
  0x49   : > { %p1334_p5 = scmp.lt.u32.totalorder %s1325_s19, %s1722_s18 }
  0x4a   : > { %p1328_p1 = pnand %p1734_p0, %p1326_p12  ;;  %p1333_p3 = por %p1332_p10, %p1331_p6 }
  0x4c   : > { %p1329_p2 = pneg %p1328_p1  ;;  %p1335_p7 = por %p1334_p5, %p1333_p3 }
  0x4e   : > { %p1336_p4 = pnand %p1335_p7, %p1329_p2 }
  0x50   : > { %1339 = shalt.err (!%p1336_p4)
}
  0x51   : > { %s1340_s23 = scalar_lea.vmem %s1726_s16, 64  ;;  %s1554_s14 = smov [#allocation5]  }
  0x52   : > { %p1341_p12 = scmp.ne.s32.totalorder %s1726_s16, %s1340_s23  ;;  %s1345_s17 = sshll.u32 %s1554_s14, 4  ;;  %s1346_s17 = int_to_ptr.vmem [resolvable:$false] %s1345_s17 }
  0x53   : > { %s1347_s15 = scalar_lea.vmem %s1346_s17, 128  ;;  %p1348_p11 = scmp.lt.s32.totalorder %s1726_s16, %s1346_s17 }
  0x54   : > { %p1343_p1 = pnand %p1341_p12, %p1734_p0  ;;  %p1349_p13 = scmp.lt.s32.totalorder %s1347_s15, %s1340_s23 }
  0x56   : > { %p1344_p8 = pneg %p1343_p1  ;;  %p1350_p6 = por %p1349_p13, %p1348_p11 }
  0x58   : > { %p1351_p10 = pnand %p1350_p6, %p1344_p8 }
  0x5a   : > { %1354 = shalt.err (!%p1351_p10)
}
  0x5b   : > { %1165 = dma.hbm_to_vmem [thread:$0]  (!%p1711_p9), %s1722_s18, 64, %s1726_s16, %s1728_s3  }
  0x5c   : > { %s2035_s19 = sshll.u32 %s1549_s27, 6  ;;  %s1555_s1 = smov [#allocation10]  }
  0x5d   : > { %s1763_s14 = scalar_lea.hbm %s1983_s2, %s2035_s19  ;;  %s246_s17 = sshll.u32 %s1555_s1, 4  ;;  %s247_s17 = int_to_ptr.vmem [resolvable:$true] %s246_s17 }
  0x5e   : > { %s1556_s23 = smov [#allocation11]   ;;  %s1355_s24 = scalar_lea.hbm %s1985_s4, 2048 }
  0x5f   : > { %s259_s15 = sshll.u32 %s1556_s23, 4  ;;  %p1356_p4 = scmp.ne.s32.totalorder %s1985_s4, %s1355_s24  ;;  %s260_s15 = int_to_ptr.vmem [resolvable:$true] %s259_s15 }
  0x60   : > { %p2036_p8 = scmp.ne.s32.totalorder %s2027_s21, 0  ;;  %p1362_p7 = scmp.lt.u32.totalorder %s1355_s24, %s1985_s4 }
  0x62   : > { %p1358_p11 = pnand %p1356_p4, %p2036_p8 }
  0x64   : > { %p1359_p13 = pneg %p1358_p11 }
  0x66   : > { %p1364_p2 = pnand %p1362_p7, %p1359_p13 }
  0x68   : > { %1367 = shalt.err (!%p1364_p2)
}
  0x69   : > { %s1368_s1 = scalar_lea.vmem %s247_s17, 2048  ;;  %p1376_p1 = scmp.lt.s32.totalorder %s247_s17, %s247_s17 }
  0x6a   : > { %p1369_p3 = scmp.ne.s32.totalorder %s247_s17, %s1368_s1  ;;  %p1377_p6 = scmp.lt.s32.totalorder %s1368_s1, %s1368_s1 }
  0x6c   : > { %p1371_p5 = pnand %p1369_p3, %p2036_p8  ;;  %p1378_p10 = por %p1377_p6, %p1376_p1 }
  0x6e   : > { %p1372_p12 = pneg %p1371_p5 }
  0x70   : > { %p1379_p9 = pnand %p1378_p10, %p1372_p12 }
  0x72   : > { %1382 = shalt.err (!%p1379_p9)
}
  0x73   : > { %p2037_p4 = scmp.ne.s32.totalorder %s2024_s12, 0  ;;  %s2038_s7 = smov 8  }
  0x74   : > { %s2039_s8 = smov 128   ;;  %s1383_s11 = scalar_lea.hbm %s1986_s5, 2048 }
  0x75   : > { %1155 = dma.hbm_to_vmem [thread:$0]  (!%p2037_p4), %s1985_s4, 2048, %s247_s17, [#allocation9], %s2039_s8, %s2039_s8, %s2038_s7  }
  0x76   : > { %p1384_p11 = scmp.ne.s32.totalorder %s1986_s5, %s1383_s11  ;;  %p1390_p7 = scmp.lt.u32.totalorder %s1383_s11, %s1986_s5 }
  0x78   : > { %p1386_p9 = pnand %p1384_p11, %p2036_p8 }
  0x7a   : > { %p1387_p13 = pneg %p1386_p9 }
  0x7c   : > { %p1392_p2 = pnand %p1390_p7, %p1387_p13 }
  0x7e   : > { %1395 = shalt.err (!%p1392_p2)
}
  0x7f   : > { %s1396_s1 = scalar_lea.vmem %s260_s15, 2048  ;;  %p1404_p1 = scmp.lt.s32.totalorder %s260_s15, %s260_s15 }
  0x80   : > { %p1397_p3 = scmp.ne.s32.totalorder %s260_s15, %s1396_s1  ;;  %p1405_p6 = scmp.lt.s32.totalorder %s1396_s1, %s1396_s1 }
  0x82   : > { %p1399_p5 = pnand %p1397_p3, %p2036_p8  ;;  %p1406_p10 = por %p1405_p6, %p1404_p1 }
  0x84   : > { %p1400_p12 = pneg %p1399_p5 }
  0x86   : > { %p1407_p0 = pnand %p1406_p10, %p1400_p12 }
  0x88   : > { %1410 = shalt.err (!%p1407_p0)
}
  0x89   : > { %1158 = dma.hbm_to_vmem [thread:$0]  (!%p2037_p4), %s1986_s5, 2048, %s260_s15, [#allocation12], %s2039_s8, %s2039_s8, %s2038_s7  }
  0x8a   : > { %s1063_s21 = sshll.u32 %s1708_s22, 3  ;;  %s1064_s24 = sshll.u32 %s1549_s27, 7 }
  0x8b   : > { %s1812_s11 = scalar_lea.hbm %s1981_s0, %s1064_s24  ;;  %s280_s12 = scalar_lea.vmem [#allocation2], %s1063_s21 }
  0x8c   : > { %s287_s10 = sshll.u32 %s280_s12, 4  ;;  %s2040_s23 = sshll.u32 %s1708_s22, 2  ;;  %s1816_s10 = int_to_ptr.vmem [resolvable:$true] %s287_s10 }
  0x8d   : > { %s316_s16 = scalar_lea.vmem [#allocation7], %s2040_s23  ;;  %s277_s15 = scalar_lea.sflag [#allocation3], %s1708_s22 }
  0x8e   : > { %s323_s18 = sshll.u32 %s316_s16, 4  ;;  %s1411_s7 = scalar_lea.hbm %s1812_s11, 128  ;;  %s1818_s18 = int_to_ptr.vmem [resolvable:$true] %s323_s18 }
  0x8f   : > { %p1412_p0 = scmp.ne.s32.totalorder %s1812_s11, %s1411_s7  ;;  %p2041_p8 = scmp.ne.s32.totalorder %s2034_s26, 0 }
  0x90   : > { %s1416_s17 = scalar_lea.hbm %s1981_s0, 256  ;;  %p1417_p9 = scmp.lt.u32.totalorder %s1812_s11, %s1981_s0 }
  0x91   : > { %p1414_p4 = pnand %p1412_p0, %p2041_p8  ;;  %p1418_p13 = scmp.lt.u32.totalorder %s1416_s17, %s1411_s7 }
  0x92   : > { %p1420_p2 = scmp.lt.u32.totalorder %s1411_s7, %s1812_s11 }
  0x93   : > { %p1415_p11 = pneg %p1414_p4  ;;  %p1419_p7 = por %p1418_p13, %p1417_p9 }
  0x95   : > { %p1421_p3 = por %p1420_p2, %p1419_p7 }
  0x97   : > { %p1422_p5 = pnand %p1421_p3, %p1415_p11 }
  0x99   : > { %1425 = shalt.err (!%p1422_p5)
}
  0x9a   : > { %s1426_s22 = scalar_lea.vmem %s1816_s10, 128  ;;  %s1557_s24 = smov [#allocation2]  }
  0x9b   : > { %p1427_p12 = scmp.ne.s32.totalorder %s1816_s10, %s1426_s22  ;;  %s1431_s20 = sshll.u32 %s1557_s24, 4  ;;  %s1432_s20 = int_to_ptr.vmem [resolvable:$false] %s1431_s20 }
  0x9c   : > { %s1433_s19 = scalar_lea.vmem %s1432_s20, 256  ;;  %p1434_p10 = scmp.lt.s32.totalorder %s1816_s10, %s1432_s20 }
  0x9d   : > { %p1429_p1 = pnand %p1427_p12, %p2041_p8  ;;  %p1435_p0 = scmp.lt.s32.totalorder %s1433_s19, %s1426_s22 }
  0x9f   : > { %p1430_p6 = pneg %p1429_p1  ;;  %p1436_p4 = por %p1435_p0, %p1434_p10 }
  0xa1   : > { %p1437_p9 = pnand %p1436_p4, %p1430_p6 }
  0xa3   : > { %1440 = shalt.err (!%p1437_p9)
}
  0xa4   : > { %p2042_p11 = scmp.ne.s32.totalorder %s2032_s29, 0  ;;  %s1441_s12 = scalar_lea.hbm %s1763_s14, 64 }
  0xa5   : > { %p1442_p13 = scmp.ne.s32.totalorder %s1763_s14, %s1441_s12  ;;  %s1446_s7 = scalar_lea.hbm %s1983_s2, 128 }
  0xa6   : > { %1162 = dma.hbm_to_vmem [thread:$0]  (!%p2042_p11), %s1812_s11, 128, %s1816_s10, %s277_s15  }
  0xa7   : > { %p1444_p7 = pnand %p1442_p13, %p2041_p8  ;;  %p1447_p3 = scmp.lt.u32.totalorder %s1763_s14, %s1983_s2 }
  0xa8   : > { %p1448_p5 = scmp.lt.u32.totalorder %s1446_s7, %s1441_s12  ;;  %p1450_p1 = scmp.lt.u32.totalorder %s1441_s12, %s1763_s14 }
  0xa9   : > { %p1445_p2 = pneg %p1444_p7 }
  0xaa   : > { %p1449_p12 = por %p1448_p5, %p1447_p3 }
  0xac   : > { %p1451_p6 = por %p1450_p1, %p1449_p12 }
  0xae   : > { %p1452_p10 = pnand %p1451_p6, %p1445_p2 }
  0xb0   : > { %1455 = shalt.err (!%p1452_p10)
}
  0xb1   : > { %s1456_s11 = scalar_lea.vmem %s1818_s18, 64  ;;  %s1558_s10 = smov [#allocation7]  }
  0xb2   : > { %p1457_p0 = scmp.ne.s32.totalorder %s1818_s18, %s1456_s11  ;;  %s1461_s15 = sshll.u32 %s1558_s10, 4  ;;  %s1462_s15 = int_to_ptr.vmem [resolvable:$false] %s1461_s15 }
  0xb3   : > { %s1463_s17 = scalar_lea.vmem %s1462_s15, 128  ;;  %p1464_p13 = scmp.lt.s32.totalorder %s1818_s18, %s1462_s15 }
  0xb4   : > { %p1459_p4 = pnand %p1457_p0, %p2041_p8  ;;  %p1465_p7 = scmp.lt.s32.totalorder %s1463_s17, %s1456_s11 }
  0xb6   : > { %p1460_p9 = pneg %p1459_p4  ;;  %p1466_p3 = por %p1465_p7, %p1464_p13 }
  0xb8   : > { %p1467_p5 = pnand %p1466_p3, %p1460_p9 }
  0xba   : > { %1470 = shalt.err (!%p1467_p5)
}
  0xbb   : > { %1168 = dma.hbm_to_vmem [thread:$0]  (!%p2042_p11), %s1763_s14, 64, %s1818_s18, %s1728_s3  }
  0xbc   : > { %p2043_p2 = scmp.ne.s32.totalorder %s2023_s9, 0 }
  0xbd   : > { %s1867_s26 = sand.u32 (!%p2043_p2), 1, %s1541_s25   ;;  %p2044_p8 = scmp.ne.s32.totalorder (!%p2043_p2), %s2020_s30, 0 }
  0xbe   : > { %332 = sbr.rel (%p2043_p2) target bundleno = 987 (0x3db), region = 48  ;;  %s1070_s13 = sshll.u32 (!%p2043_p2), %s1867_s26, 3 }
  0xbf   : > { %s335_s21 = scalar_lea.sflag (!%p2043_p2), [#allocation3], %s1867_s26  ;;  %s1873_s22 = scalar_lea.vmem (!%p2043_p2), [#allocation2], %s1070_s13 }
  0xc5   : > { %1516 = dma.done.wait (%p2044_p8), %s335_s21, 128  }
  0xc6   : > { %1518 = vsyncadd (%p2044_p8), %s335_s21, 4294967168  ;;  %s343_s3 = sand.u32 1, %s1622_s28   ;;  %s1071_s9 = sshll.u32 %s1867_s26, 2 }
  0xc7   : > { %s344_s29 = scalar_lea.sflag [#allocation6], %s343_s3  ;;  %s1881_s14 = scalar_lea.vmem [#allocation5], %s1071_s9 }
  0xc8   : > { %1520 = dma.done.wait (%p2044_p8), %s344_s29, 128  }
  0xc9   : > { %1522 = vsyncadd (%p2044_p8), %s344_s29, 4294967168  ;;  %s1887_s18 = scalar_lea.vmem [#allocation7], %s1071_s9  ;;  %p2045_p11 = scmp.eq.s32.totalorder %s1622_s28, 0 }
  0xcb   : > { %1524 = dma.done.wait (%p2045_p11), [#allocation9], 4096   ;;  %p2046_p12 = pmov %p2045_p11 }
  0xcc   : > { %p2047_p1 = pmov %p2045_p11 }
  0xcd   : > { %1526 = vsyncadd (%p2046_p12), [#allocation9], 4294963200 }
  0xce   : > { %1528 = dma.done.wait (%p2047_p1), [#allocation12], 2048   ;;  %p2048_p6 = pmov %p2047_p1 }
  0xcf   : > { %v1559_v0 = vmov 0   ;;  %v1219_v1 = vld [vmem:[#allocation8 + $0x4] ss:$8 sps:$4 sm:$0xff]   ;;  %v1221_v2 = vld [vmem:[#allocation8] ss:$8 sps:$4 sm:$0xff]   ;;  %v689_v54 = vlaneseq  ;;  %s2049_s20 = sld [smem:[#allocation24_spill]] }
  0xd0   : > { %1530 = vsyncadd (%p2048_p6), [#allocation12], 4294965248  ;;  %541 = vmatprep.mubr.bf16.mxu0 %v1559_v0  ;;  %679 = vmatprep.mubr.bf16.mxu1 %v1559_v0  ;;  %v1222_v3 = vld [vmem:[#allocation10 + $0x4] ss:$8 sps:$4 sm:$0xff]   ;;  %v1224_v4 = vld [vmem:[#allocation10] ss:$8 sps:$4 sm:$0xff]  }
  0xd1   : > { %509 = vmatprep.subr.bf16.mxu0 %v1219_v1  ;;  %v1225_v5 = vld [vmem:[#allocation8 + $0x14] ss:$8 sps:$4 sm:$0xff]   ;;  %v1227_v6 = vld [vmem:[#allocation8 + $0x10] ss:$8 sps:$4 sm:$0xff]   ;;  %647 = vmatprep.subr.bf16.mxu1 %v1222_v3  ;;  %v1231_v9 = vld [vmem:[#allocation8 + $0x24] ss:$8 sps:$4 sm:$0xff]  }
  0xd2   : > { %510 = vmatpush1.bf16.msra.mxu0 %v1221_v2  ;;  %v1228_v7 = vld [vmem:[#allocation10 + $0x14] ss:$8 sps:$4 sm:$0xff]   ;;  %648 = vmatpush1.bf16.msra.mxu1 %v1224_v4  ;;  %v1230_v8 = vld [vmem:[#allocation10 + $0x10] ss:$8 sps:$4 sm:$0xff]   ;;  %v1233_v10 = vld [vmem:[#allocation8 + $0x20] ss:$8 sps:$4 sm:$0xff]  }
  0xd3   : > { %511 = vmatprep.subr.bf16.mxu0 %v1225_v5  ;;  %649 = vmatprep.subr.bf16.mxu1 %v1228_v7  ;;  %v1234_v11 = vld [vmem:[#allocation10 + $0x24] ss:$8 sps:$4 sm:$0xff]   ;;  %v1237_v12 = vld [vmem:[#allocation8 + $0x34] ss:$8 sps:$4 sm:$0xff]   ;;  %v1236_v13 = vld [vmem:[#allocation10 + $0x20] ss:$8 sps:$4 sm:$0xff]  }
  0xd4   : > { %v1240_v14 = vld [vmem:[#allocation10 + $0x34] ss:$8 sps:$4 sm:$0xff]   ;;  %v1239_v15 = vld [vmem:[#allocation8 + $0x30] ss:$8 sps:$4 sm:$0xff]   ;;  %v1243_v16 = vld [vmem:[#allocation8 + $0x44] ss:$8 sps:$4 sm:$0xff]  }
  0xd5   : > { %v1242_v17 = vld [vmem:[#allocation10 + $0x30] ss:$8 sps:$4 sm:$0xff]   ;;  %v1246_v18 = vld [vmem:[#allocation10 + $0x44] ss:$8 sps:$4 sm:$0xff]   ;;  %v1245_v19 = vld [vmem:[#allocation8 + $0x40] ss:$8 sps:$4 sm:$0xff]  }
  0xd6   : > { %512 = vmatpush1.bf16.msra.mxu0 %v1227_v6  ;;  %650 = vmatpush1.bf16.msra.mxu1 %v1230_v8  ;;  %v1249_v20 = vld [vmem:[#allocation8 + $0x54] ss:$8 sps:$4 sm:$0xff]   ;;  %v1248_v21 = vld [vmem:[#allocation10 + $0x40] ss:$8 sps:$4 sm:$0xff]   ;;  %v1251_v23 = vld [vmem:[#allocation8 + $0x50] ss:$8 sps:$4 sm:$0xff]  }
  0xd7   : > { %513 = vmatprep.subr.bf16.mxu0 %v1231_v9  ;;  %651 = vmatprep.subr.bf16.mxu1 %v1234_v11  ;;  %v1252_v22 = vld [vmem:[#allocation10 + $0x54] ss:$8 sps:$4 sm:$0xff]   ;;  %v1255_v24 = vld [vmem:[#allocation8 + $0x64] ss:$8 sps:$4 sm:$0xff]   ;;  %v1254_v25 = vld [vmem:[#allocation10 + $0x50] ss:$8 sps:$4 sm:$0xff]  }
  0xd8   : > { %v1258_v26 = vld [vmem:[#allocation10 + $0x64] ss:$8 sps:$4 sm:$0xff]   ;;  %v1257_v27 = vld [vmem:[#allocation8 + $0x60] ss:$8 sps:$4 sm:$0xff]   ;;  %v1261_v28 = vld [vmem:[#allocation8 + $0x74] ss:$8 sps:$4 sm:$0xff]  }
  0xd9   : > { %v1260_v29 = vld [vmem:[#allocation10 + $0x60] ss:$8 sps:$4 sm:$0xff]   ;;  %v1263_v30 = vld [vmem:[#allocation8 + $0x70] ss:$8 sps:$4 sm:$0xff]   ;;  %v1264_v31 = vld [vmem:[#allocation10 + $0x74] ss:$8 sps:$4 sm:$0xff]  }
  0xda   : > { %514 = vmatpush1.bf16.msra.mxu0 %v1233_v10  ;;  %652 = vmatpush1.bf16.msra.mxu1 %v1236_v13  ;;  %v1900_v32 = vld [vmem:[%s1873_s22] sm:$0xff]  ;;  %v1266_v34 = vld [vmem:[#allocation10 + $0x70] ss:$8 sps:$4 sm:$0xff]   ;;  %v1272_v37 = vld [vmem:[#allocation11 + $0x14] ss:$8 sps:$4 sm:$0xff]   ;;  %v1909_v55 = vshrl.u32 %v689_v54, 7 }
  0xdb   : > { %515 = vmatprep.subr.bf16.mxu0 %v1237_v12  ;;  %653 = vmatprep.subr.bf16.mxu1 %v1240_v14  ;;  %v1269_v33 = vld [vmem:[#allocation11 + $0x4] ss:$8 sps:$4 sm:$0xff]   ;;  %v411_v35 = vpack.c.bf16 %v1900_v32, %v1900_v32  ;;  %v1267_v36 = vld [vmem:[#allocation11] ss:$8 sps:$4 sm:$0xff]   ;;  %v550_v38 = vld [vmem:[%s1881_s14] sm:$0xf]  ;;  %v853_v53 = vmul.f32 %v1900_v32, %v1900_v32 }
  0xdc   : > { %v1270_v39 = vld [vmem:[#allocation11 + $0x10] ss:$8 sps:$4 sm:$0xff]   ;;  %v1275_v40 = vld [vmem:[#allocation11 + $0x24] ss:$8 sps:$4 sm:$0xff]   ;;  %v1273_v41 = vld [vmem:[#allocation11 + $0x20] ss:$8 sps:$4 sm:$0xff]  }
  0xdd   : > { %v1278_v42 = vld [vmem:[#allocation11 + $0x34] ss:$8 sps:$4 sm:$0xff]   ;;  %v1276_v43 = vld [vmem:[#allocation11 + $0x30] ss:$8 sps:$4 sm:$0xff]   ;;  %v1281_v44 = vld [vmem:[#allocation11 + $0x44] ss:$8 sps:$4 sm:$0xff]   ;;  %854 = vadd.xlane.f32.xlu0 %v853_v53 }
  0xde   : > { %516 = vmatpush1.bf16.msra.mxu0 %v1239_v15  ;;  %654 = vmatpush1.bf16.msra.mxu1 %v1242_v17  ;;  %v1279_v45 = vld [vmem:[#allocation11 + $0x40] ss:$8 sps:$4 sm:$0xff]   ;;  %v1284_v46 = vld [vmem:[#allocation11 + $0x54] ss:$8 sps:$4 sm:$0xff]   ;;  %v1282_v47 = vld [vmem:[#allocation11 + $0x50] ss:$8 sps:$4 sm:$0xff]  }
  0xdf   : > { %517 = vmatprep.subr.bf16.mxu0 %v1243_v16  ;;  %655 = vmatprep.subr.bf16.mxu1 %v1246_v18  ;;  %v1287_v48 = vld [vmem:[#allocation11 + $0x64] ss:$8 sps:$4 sm:$0xff]   ;;  %v1285_v49 = vld [vmem:[#allocation11 + $0x60] ss:$8 sps:$4 sm:$0xff]   ;;  %v1290_v50 = vld [vmem:[#allocation11 + $0x74] ss:$8 sps:$4 sm:$0xff]  }
  0xe0   : > { %v1288_v51 = vld [vmem:[#allocation11 + $0x70] ss:$8 sps:$4 sm:$0xff]   ;;  %v691_v56 = vsub.s32 0, %v1909_v55  ;;  %v697_v57 = vsub.s32 2, %v1909_v55  ;;  %v1916_v58 = vld [vmem:[%s1987_s6] sm:$0xff]  ;;  %v842_v10 = vsub.s32 1, %v1909_v55 }
  0xe1   : > { %v701_v52 = vld [vmem:[%s1887_s18] sm:$0xf]  ;;  %v848_v11 = vsub.s32 3, %v1909_v55  ;;  %s1126_s19 = sshll.u32 %s1622_s28, 7  ;;  %s408_s12 = scalar_lea.vmem [#allocation13], %s1070_s13 }
  0xe2   : > { %518 = vmatpush1.bf16.msra.mxu0 %v1245_v19  ;;  %656 = vmatpush1.bf16.msra.mxu1 %v1248_v21  ;;  %v692_v61 = vrot.slane %v1916_v58, %v691_v56  ;;  %v698_v62 = vrot.slane %v1916_v58, %v697_v57  ;;  %v843_v12 = vrot.slane %v1916_v58, %v842_v10  ;;  %s915_s23 = sshll.u32 %s408_s12, 4  ;;  %s2050_s8 = sld [smem:[#allocation27_spill]]  ;;  %s1939_s23 = int_to_ptr.vmem [resolvable:$true] %s915_s23 }
  0xe3   : > { %519 = vmatprep.subr.bf16.mxu0 %v1249_v20  ;;  %657 = vmatprep.subr.bf16.mxu1 %v1252_v22  ;;  %v849_v16 = vrot.slane %v1916_v58, %v848_v11  ;;  %s902_s11 = scalar_lea.sflag [#allocation4], %s1867_s26  ;;  %s1471_s10 = scalar_lea.vmem %s1939_s23, 128 }
  0xe4   : > { %p1472_p10 = scmp.ne.s32.totalorder %s1939_s23, %s1471_s10  ;;  %p2051_p0 = scmp.ne.s32.totalorder %s2049_s20, 0 }
  0xe5   : > { %s1560_s28 = smov [#allocation13]  }
  0xe6   : > { %520 = vmatpush1.bf16.msra.mxu0 %v1251_v23  ;;  %658 = vmatpush1.bf16.msra.mxu1 %v1254_v25  ;;  %p1473_p4 = pnand %p1472_p10, %p2051_p0  ;;  %s1475_s15 = sshll.u32 %s1560_s28, 4  ;;  %s1476_s15 = int_to_ptr.vmem [resolvable:$false] %s1475_s15 }
  0xe7   : > { %521 = vmatprep.subr.bf16.mxu0 %v1255_v24  ;;  %659 = vmatprep.subr.bf16.mxu1 %v1258_v26  ;;  %s1477_s17 = scalar_lea.vmem %s1476_s15, 256  ;;  %p1478_p13 = scmp.lt.s32.totalorder %s1939_s23, %s1476_s15 }
  0xe8   : > { %s1937_s1 = scalar_lea.hbm %s2050_s8, %s1126_s19  ;;  %p1474_p9 = pneg %p1473_p4 }
  0xe9   : > { %p1479_p7 = scmp.lt.s32.totalorder %s1477_s17, %s1471_s10 }
  0xea   : > { %522 = vmatpush1.bf16.msra.mxu0 %v1257_v27  ;;  %660 = vmatpush1.bf16.msra.mxu1 %v1260_v29 }
  0xeb   : > { %523 = vmatprep.subr.bf16.mxu0 %v1261_v28  ;;  %661 = vmatprep.subr.bf16.mxu1 %v1264_v31  ;;  %p1480_p3 = por %p1479_p7, %p1478_p13 }
  0xed   : > { %p1481_p5 = pnand %p1480_p3, %p1474_p9 }
  0xee   : > { %524 = vmatpush1.bf16.msra.mxu0 %v1263_v30  ;;  %662 = vmatpush1.bf16.msra.mxu1 %v1266_v34 }
  0xef   : > { %798 = vmatprep.subr.bf16.mxu0 %v1269_v33 }
  0xf1   : > { %542 = vmatmul.mubr.bf16.vlgmr.msra.gmra.mrb[0].mxu0 %v411_v35  ;;  %680 = vmatmul.mubr.bf16.vlgmr.msra.gmra.mrb[0].mxu1 %v550_v38 }
  0xf2   : > { %799 = vmatpush1.bf16.msra.mxu0 %v1267_v36  ;;  %830 = vmatprep.mubr.bf16.mxu0 %v1559_v0 }
  0xf3   : > { %800 = vmatprep.subr.bf16.mxu0 %v1272_v37 }
  0xf6   : > { %801 = vmatpush1.bf16.msra.mxu0 %v1270_v39 }
  0xf7   : > { %802 = vmatprep.subr.bf16.mxu0 %v1275_v40 }
  0xfa   : > { %803 = vmatpush1.bf16.msra.mxu0 %v1273_v41  ;;  %v880_v41 = vsub.s32 6, %v1909_v55 }
  0xfb   : > { %804 = vmatprep.subr.bf16.mxu0 %v1278_v42 }
  0xfe   : > { %805 = vmatpush1.bf16.msra.mxu0 %v1276_v43 }
  0xff   : > { %806 = vmatprep.subr.bf16.mxu0 %v1281_v44  ;;  %v881_v44 = vrot.slane %v1916_v58, %v880_v41 }
 0x102   : > { %807 = vmatpush1.bf16.msra.mxu0 %v1279_v45 }
 0x103   : > { %808 = vmatprep.subr.bf16.mxu0 %v1284_v46 }
 0x106   : > { %809 = vmatpush1.bf16.msra.mxu0 %v1282_v47 }
 0x107   : > { %810 = vmatprep.subr.bf16.mxu0 %v1287_v48 }
 0x10a   : > { %811 = vmatpush1.bf16.msra.mxu0 %v1285_v49 }
 0x10b   : > { %812 = vmatprep.subr.bf16.mxu0 %v1290_v50 }
 0x10e   : > { %813 = vmatpush1.bf16.msra.mxu0 %v1288_v51  ;;  %v897_v51 = vsub.s32 5, %v1909_v55 }
 0x110   : > { %v898_v56 = vrot.slane %v1916_v58, %v897_v51 }
 0x111   : > { %831 = vmatmul.mubr.bf16.vlgmr.msra.gmra.mrb[4].mxu0 %v701_v52 }
 0x16a   : > { %v855_v25 = vpop.xlane.xlu0 %854 }
 0x16b   : > { %v859_v26 = vadd.f32 1e-06, %v855_v25 }
 0x16d   : > { %1291 = vrsqrt.f32 %v859_v26  ;;  %vm862_vm0 = vcmp.eq.f32.partialorder %v859_v26, inf  ;;  %v865_v31 = vand.u32 2147483648, %v859_v26  ;;  %vm864_vm1 = vcmp.eq.f32.partialorder %v859_v26, 0.0 }
 0x177   : > { %v1292_v27 = vpop.eup %1291 }
 0x178   : > { %v861_v30 = vmul.f32 %v1292_v27, %v859_v26 }
 0x17a   : > { %v863_v33 = vsel %vm862_vm0, %v859_v26, %v861_v30 }
 0x17b   : > { %v866_v34 = vsel %vm864_vm1, %v865_v31, %v863_v33 }
 0x17c   : > { %v867_v35 = vmul.f32 0.5, %v866_v34 }
 0x1c4   : > { %v543_v59 = vpop.f32.mrb[0].mxu0  ;;  %v681_v63 = vpop.f32.mrb[0].mxu1 }
 0x1c5   : > { %v545_v60 = vpop.f32.mrb[1].mxu0  ;;  %v688_v1 = vadd.f32 %v681_v63, %v543_v59  ;;  %v683_v3 = vpop.f32.mrb[1].mxu1 }
 0x1c6   : > { %v547_v0 = vpop.f32.mrb[2].mxu0  ;;  %v685_v4 = vpop.f32.mrb[2].mxu1  ;;  %v699_v6 = vadd.f32 %v698_v62, %v683_v3 }
 0x1c7   : > { %v548_v2 = vpop.f32.mrb[3].mxu0  ;;  %v693_v5 = vadd.f32 %v692_v61, %v688_v1  ;;  %v686_v7 = vpop.f32.mrb[3].mxu1 }
 0x1c9   : > { %v694_v8 = vmax.f32 %v693_v5, 0.0 }
 0x1cb   : > { %v700_v9 = vmul.f32 %v699_v6, %v694_v8 }
 0x1e4   : > { %v832_v13 = vpop.f32.mrb[4].mxu0 }
 0x1e5   : > { %v839_v14 = vadd.f32 %v832_v13, %v545_v60  ;;  %v834_v15 = vpop.f32.mrb[5].mxu0 }
 0x1e6   : > { %v836_v17 = vpop.f32.mrb[6].mxu0  ;;  %v850_v21 = vadd.f32 %v849_v16, %v834_v15 }
 0x1e7   : > { %v844_v18 = vadd.f32 %v843_v12, %v839_v14  ;;  %v837_v19 = vpop.f32.mrb[7].mxu0 }
 0x1e9   : > { %v845_v20 = vmax.f32 %v844_v18, 0.0 }
 0x1eb   : > { %v851_v22 = vmul.f32 %v850_v21, %v845_v20 }
 0x1ed   : > { %v852_v23 = vadd.f32 %v851_v22, %v700_v9 }
 0x1ef   : > { %v856_v24 = vmul.f32 %v852_v23, %v852_v23 }
 0x1f1   : > { %857 = vadd.xlane.f32.xlu0 %v856_v24 }
 0x27e   : > { %v858_v28 = vpop.xlane.xlu0 %857 }
 0x27f   : > { %v868_v29 = vadd.f32 1e-06, %v858_v28 }
 0x281   : > { %1293 = vrsqrt.f32 %v868_v29 }
 0x28b   : > { %v1294_v36 = vpop.eup %1293 }
 0x28c   : > { %v870_v37 = vmul.f32 %v1294_v36, %v867_v35 }
 0x28e   : > { %v871_v38 = vmin.f32 %v870_v37, 1.0 }
 0x290   : > { %v872_v39 = vmul.f32 %v871_v38, %v852_v23 }
 0x292   : > { %v873_v40 = vadd.f32 %v872_v39, %v1900_v32  ;;  %v892_v32 = vsub.s32 4, %v1909_v55 }
 0x294   : > { %874 = vadd.xlane.f32.xlu1 %v873_v40  ;;  %v893_v52 = vrot.slane %v1916_v58, %v892_v32 }
 0x321   : > { %v875_v42 = vpop.xlane.xlu1 %874 }
 0x322   : > { %v876_v43 = vmul.f32 0.03125, %v875_v42 }
 0x324   : > { %v877_v45 = vsub.f32 %v873_v40, %v876_v43 }
 0x326   : > { %v882_v46 = vmul.f32 %v881_v44, %v877_v45 }
 0x328   : > { %v883_v47 = vmul.f32 %v882_v46, %v882_v46 }
 0x32a   : > { %884 = vadd.xlane.f32.xlu1 %v883_v47 }
 0x3b7   : > { %v885_v48 = vpop.xlane.xlu1 %884 }
 0x3b8   : > { %v886_v49 = vmul.f32 0.03125, %v885_v48 }
 0x3ba   : > { %v887_v50 = vadd.f32 1e-05, %v886_v49 }
 0x3bc   : > { %1295 = vrsqrt.f32 %v887_v50 }
 0x3c6   : > { %v1296_v53 = vpop.eup %1295 }
 0x3c7   : > { %v889_v54 = vmul.f32 %v1296_v53, %v882_v46 }
 0x3c9   : > { %v894_v57 = vmul.f32 %v893_v52, %v889_v54 }
 0x3cb   : > { %v899_v59 = vadd.f32 %v898_v56, %v894_v57 }
 0x3cd   : > { %900 = vst [vmem:[%s408_s12] sm:$0xff] %v899_v59 }
 0x3ce   : > { %1484 = shalt.err (!%p1481_p5)
}
 0x3cf   : > { %s1485_s26 = scalar_lea.hbm %s1937_s1, 128  ;;  %s1489_s22 = scalar_lea.hbm %s2050_s8, 256 }
 0x3d0   : > { %p1486_p2 = scmp.ne.s32.totalorder %s1937_s1, %s1485_s26  ;;  %p1490_p12 = scmp.lt.u32.totalorder %s1937_s1, %s2050_s8 }
 0x3d1   : > { %p1491_p1 = scmp.lt.u32.totalorder %s1489_s22, %s1485_s26  ;;  %p1493_p10 = scmp.lt.u32.totalorder %s1485_s26, %s1937_s1 }
 0x3d2   : > { %p1487_p8 = pnand %p1486_p2, %p2051_p0 }
 0x3d3   : > { %p1492_p6 = por %p1491_p1, %p1490_p12 }
 0x3d4   : > { %p1488_p11 = pneg %p1487_p8 }
 0x3d5   : > { %p1494_p4 = por %p1493_p10, %p1492_p6 }
 0x3d7   : > { %p1495_p9 = pnand %p1494_p4, %p1488_p11 }
 0x3d9   : > { %1498 = shalt.err (!%p1495_p9)
}
 0x3da   : > { %1147 = dma.vmem_to_hbm [thread:$0]  (%p2051_p0), %s1939_s23, 128, %s1937_s1, %s902_s11  }
 0x3db PF: > { %s2052_s29 = sld [smem:[#allocation19_spill]]  ;;  %s2053_s14 = sld [smem:[#allocation21_spill]] }
 0x3dc   : > { %p2055_p7 = scmp.ge.s32.totalorder %s1549_s27, 2 }
 0x3e1   : > { %s927_s18 = sand.u32 1, %s2052_s29   ;;  %p2054_p13 = scmp.ne.s32.totalorder %s2053_s14, 0 }
 0x3e2   : > { %s928_s30 = scalar_lea.sflag [#allocation4], %s927_s18 }
 0x3e3   : > { %p1170_p3 = pnand %p2055_p7, %p2054_p13 }
 0x3e5   : > { %1532 = dma.done.wait (!%p1170_p3), %s928_s30, 128  }
 0x3e6   : > { %1534 = vsyncadd (!%p1170_p3), %s928_s30, 4294967168  ;;  %s2056_s27 = sld [smem:[#allocation22_spill]]  ;;  %s2057_s19 = sld [smem:[#allocation20_spill]] }
 0x3e7   : > { %s2058_s26 = sld [smem:[#allocation23_spill]]  ;;  %s2059_s24 = smov %s1541_s25 }
 0x3ec   : > { %p25_p5 = scmp.ge.s32.totalorder %s2056_s27, 4   ;;  %s2060_s25 = smov %s2057_s19 }
 0x3ee   :  { %27 = sbr.rel (!%p25_p5) target bundleno = 13 (0xd), region = 129 }
 0x3f5   :  { %933 = vsyncpa [#allocation3], 1 }
 0x3f6   :  { %935 = vsyncpa [#allocation3 + $0x1], 1 }
 0x3f7   :  { %936 = vsyncpa [#allocation6], 1 }
 0x3f8   :  { %938 = vsyncpa [#allocation6 + $0x1], 1 }
 0x3f9   :  { %939 = vsyncpa [#allocation9], 1 }
 0x3fa   :  { %940 = vsyncpa [#allocation12], 1 }
 0x3fb   :  { %941 = vsyncpa [#allocation4], 1 }
 0x3fc   :  { %943 = vsyncpa [#allocation4 + $0x1], 1 }

</bundles_post_ra>
